<compile_context>
chip_gen: v5e
topology: v5e:2x2
jax: 0.10.0
libtpu: 0.0.40
codegen_flags: <defaults>
</compile_context>

<pallas_src>
import functools

import jax
import jax.numpy as jnp
from jax.experimental import pallas as pl
from jax.experimental.pallas import tpu as pltpu


def conv1x1_pad_kernel(x_ref, w_ref, b_ref, o_ref, xpad_ref, *, H, W, pad):
    # x_ref:    (1, Cin, H*W)        f32  (NCHW, spatial flattened, lane-dense)
    # w_ref:    (Cout, Cin)          f32  (1x1 kernel taps)
    # b_ref:    (Cout, 1)            f32
    # o_ref:    (1, Cout, Hout*Wout) f32  (flattened padded output, lane-dense)
    # xpad_ref: (Cin, Hout*Wout)     f32  VMEM scratch (zero-padded input plane)
    Cin = x_ref.shape[1]
    Cout = o_ref.shape[1]
    S = o_ref.shape[2]                      # Hout * Wout
    Wout = W + 2 * pad

    # Build the zero-padded input plane in VMEM: pad the tiny input instead of
    # scattering into the big output.  ~85 KiB of VMEM traffic, negligible vs
    # the lane-dense HBM output store.
    xpad_ref[...] = jnp.zeros_like(xpad_ref)
    for r in range(H):                      # static unroll, H is small
        dst = (pad + r) * Wout + pad        # static lane offset of row r
        xpad_ref[:, pl.ds(dst, W)] = x_ref[0, :, pl.ds(r * W, W)]

    # Channel mix in exact f32 on the VPU: Cin fused multiply-adds over the
    # whole padded plane.  Halo positions stay exactly `bias` (conv of zeros).
    w = w_ref[...]                                        # (Cout, Cin)
    acc = jnp.broadcast_to(b_ref[...], (Cout, S))         # bias everywhere
    for c in range(Cin):                                  # Cin = 4 -> 4 FMAs
        acc = acc + w[:, c:c + 1] * xpad_ref[pl.ds(c, 1), :]

    # Single lane-dense full-block store (S = Hout*Wout lanes per channel).
    o_ref[0] = acc.astype(o_ref.dtype)


def conv2_forward(x_nchw, weight_oihw, bias, *, pad=28):
    """Equivalent of Conv2.forward(x): Conv2d(k=1, s=1, p=28) with bias, f32."""
    N, Cin, H, W = x_nchw.shape
    Cout = weight_oihw.shape[0]
    Hout, Wout = H + 2 * pad, W + 2 * pad
    S = Hout * Wout

    # Free reshapes (NCHW is already channel-major); everything stays f32.
    x_flat = x_nchw.reshape(N, Cin, H * W).astype(jnp.float32)
    w2d = weight_oihw.reshape(Cout, Cin).astype(jnp.float32)
    b2d = bias.reshape(Cout, 1).astype(jnp.float32)

    kern = functools.partial(conv1x1_pad_kernel, H=H, W=W, pad=pad)

    out_flat = pl.pallas_call(
        kern,
        out_shape=jax.ShapeDtypeStruct((N, Cout, S), jnp.float32),
        grid=(N,),
        in_specs=[
            pl.BlockSpec((1, Cin, H * W), lambda n: (n, 0, 0)),
            pl.BlockSpec((Cout, Cin), lambda n: (0, 0)),
            pl.BlockSpec((Cout, 1), lambda n: (0, 0)),
        ],
        out_specs=pl.BlockSpec((1, Cout, S), lambda n: (n, 0, 0)),
        scratch_shapes=[pltpu.VMEM((Cin, S), jnp.float32)],
        compiler_params=pltpu.CompilerParams(
            dimension_semantics=("parallel",),
        ),
    )(x_flat, w2d, b2d)

    # Contiguous split of the last dim -> free metadata reshape outside Pallas.
    return out_flat.reshape(N, Cout, Hout, Wout)


if __name__ == "__main__":
    # Small shapes consistent with the module: N=2, Cin=4, Cout=8, H=W=16.
    N, Cin, Cout, H, W = 2, 4, 8, 16, 16
    PAD = 28

    key = jax.random.PRNGKey(0)
    kx, kw, kb = jax.random.split(key, 3)

    x = jax.random.normal(kx, (N, Cin, H, W), dtype=jnp.float32)
    # Deterministic parameter init (shapes follow nn.Conv2d(Cin, Cout, 1)):
    fan_in = Cin * 1 * 1
    bound = 1.0 / (fan_in ** 0.5)
    weight = jax.random.uniform(kw, (Cout, Cin, 1, 1), jnp.float32,
                                minval=-bound, maxval=bound)
    bias = jax.random.uniform(kb, (Cout,), jnp.float32,
                              minval=-bound, maxval=bound)

    out = conv2_forward(x, weight, bias, pad=PAD)
    out = jax.block_until_ready(out)

    # Reference: XLA conv with the same semantics as PyTorch Conv2d(k=1, s=1,
    # p=28).  HIGHEST precision keeps the f32 reference truly f32 on TPU.
    ref = jax.lax.conv_general_dilated(
        x, weight, window_strides=(1, 1), padding=((PAD, PAD), (PAD, PAD)),
        dimension_numbers=("NCHW", "OIHW", "NCHW"),
        precision=jax.lax.Precision.HIGHEST)
    ref = ref + bias[None, :, None, None]

    assert out.shape == (N, Cout, H + 2 * PAD, W + 2 * PAD)
    # Full-f32 kernel -> tight tolerance.
    assert jnp.allclose(out, ref, atol=1e-4, rtol=1e-4)
    print("KERNEL_OK")
</pallas_src>

<mosaic_0001>
module attributes {stable_mosaic.version = 11 : i64} {
  func.func @conv1x1_pad_kernel(%arg0: i32, %arg1: memref<1x4x256xf32, #tpu.memory_space<vmem>>, %arg2: memref<8x4xf32, #tpu.memory_space<vmem>>, %arg3: memref<8x1xf32, #tpu.memory_space<vmem>>, %arg4: memref<1x8x5184xf32, #tpu.memory_space<vmem>>, %arg5: memref<4x5184xf32, #tpu.memory_space<vmem>>) attributes {dimension_semantics = [#tpu.dimension_semantics<parallel>], iteration_bounds = array<i64: 2>, scalar_prefetch = 0 : i64, scratch_operands = 1 : i64, tpu.core_type = #tpu.core_type<tc>, window_params = [{transform_indices = @transform_0, window_bounds = array<i64: 1, 4, 256>}, {pipeline_mode = #tpu.pipeline_mode<synchronous>, transform_indices = @transform_1, window_bounds = array<i64: 8, 4>}, {pipeline_mode = #tpu.pipeline_mode<synchronous>, transform_indices = @transform_2, window_bounds = array<i64: 8, 1>}, {transform_indices = @transform_3, window_bounds = array<i64: 1, 8, 5184>}]} {
    %cst = arith.constant 0.000000e+00 : f32
    %0 = vector.broadcast %cst : f32 to vector<4x5184xf32>
    %c0 = arith.constant 0 : index
    %c0_0 = arith.constant 0 : index
    %1 = vector.load %arg5[%c0, %c0_0] : memref<4x5184xf32, #tpu.memory_space<vmem>>, vector<4x5184xf32>
    tpu.vector_store %arg5[%c0, %c0_0], %0 {strides = array<i32>} : memref<4x5184xf32, #tpu.memory_space<vmem>>, vector<4x5184xf32>,
    %c0_1 = arith.constant 0 : index
    %c0_2 = arith.constant 0 : index
    %c0_3 = arith.constant 0 : index
    %2 = vector.load %arg1[%c0_1, %c0_2, %c0_3] : memref<1x4x256xf32, #tpu.memory_space<vmem>>, vector<1x4x16xf32>
    %3 = vector.shape_cast %2 : vector<1x4x16xf32> to vector<4x16xf32>
    %c0_4 = arith.constant 0 : index
    %c2044 = arith.constant 2044 : index
    %4 = vector.load %arg5[%c0_4, %c2044] : memref<4x5184xf32, #tpu.memory_space<vmem>>, vector<4x16xf32>
    tpu.vector_store %arg5[%c0_4, %c2044], %3 {strides = array<i32>} : memref<4x5184xf32, #tpu.memory_space<vmem>>, vector<4x16xf32>,
    %c0_5 = arith.constant 0 : index
    %c0_6 = arith.constant 0 : index
    %c16 = arith.constant 16 : index
    %5 = vector.load %arg1[%c0_5, %c0_6, %c16] : memref<1x4x256xf32, #tpu.memory_space<vmem>>, vector<1x4x16xf32>
    %6 = vector.shape_cast %5 : vector<1x4x16xf32> to vector<4x16xf32>
    %c0_7 = arith.constant 0 : index
    %c2116 = arith.constant 2116 : index
    %7 = vector.load %arg5[%c0_7, %c2116] : memref<4x5184xf32, #tpu.memory_space<vmem>>, vector<4x16xf32>
    tpu.vector_store %arg5[%c0_7, %c2116], %6 {strides = array<i32>} : memref<4x5184xf32, #tpu.memory_space<vmem>>, vector<4x16xf32>,
    %c0_8 = arith.constant 0 : index
    %c0_9 = arith.constant 0 : index
    %c32 = arith.constant 32 : index
    %8 = vector.load %arg1[%c0_8, %c0_9, %c32] : memref<1x4x256xf32, #tpu.memory_space<vmem>>, vector<1x4x16xf32>
    %9 = vector.shape_cast %8 : vector<1x4x16xf32> to vector<4x16xf32>
    %c0_10 = arith.constant 0 : index
    %c2188 = arith.constant 2188 : index
    %10 = vector.load %arg5[%c0_10, %c2188] : memref<4x5184xf32, #tpu.memory_space<vmem>>, vector<4x16xf32>
    tpu.vector_store %arg5[%c0_10, %c2188], %9 {strides = array<i32>} : memref<4x5184xf32, #tpu.memory_space<vmem>>, vector<4x16xf32>,
    %c0_11 = arith.constant 0 : index
    %c0_12 = arith.constant 0 : index
    %c48 = arith.constant 48 : index
    %11 = vector.load %arg1[%c0_11, %c0_12, %c48] : memref<1x4x256xf32, #tpu.memory_space<vmem>>, vector<1x4x16xf32>
    %12 = vector.shape_cast %11 : vector<1x4x16xf32> to vector<4x16xf32>
    %c0_13 = arith.constant 0 : index
    %c2260 = arith.constant 2260 : index
    %13 = vector.load %arg5[%c0_13, %c2260] : memref<4x5184xf32, #tpu.memory_space<vmem>>, vector<4x16xf32>
    tpu.vector_store %arg5[%c0_13, %c2260], %12 {strides = array<i32>} : memref<4x5184xf32, #tpu.memory_space<vmem>>, vector<4x16xf32>,
    %c0_14 = arith.constant 0 : index
    %c0_15 = arith.constant 0 : index
    %c64 = arith.constant 64 : index
    %14 = vector.load %arg1[%c0_14, %c0_15, %c64] : memref<1x4x256xf32, #tpu.memory_space<vmem>>, vector<1x4x16xf32>
    %15 = vector.shape_cast %14 : vector<1x4x16xf32> to vector<4x16xf32>
    %c0_16 = arith.constant 0 : index
    %c2332 = arith.constant 2332 : index
    %16 = vector.load %arg5[%c0_16, %c2332] : memref<4x5184xf32, #tpu.memory_space<vmem>>, vector<4x16xf32>
    tpu.vector_store %arg5[%c0_16, %c2332], %15 {strides = array<i32>} : memref<4x5184xf32, #tpu.memory_space<vmem>>, vector<4x16xf32>,
    %c0_17 = arith.constant 0 : index
    %c0_18 = arith.constant 0 : index
    %c80 = arith.constant 80 : index
    %17 = vector.load %arg1[%c0_17, %c0_18, %c80] : memref<1x4x256xf32, #tpu.memory_space<vmem>>, vector<1x4x16xf32>
    %18 = vector.shape_cast %17 : vector<1x4x16xf32> to vector<4x16xf32>
    %c0_19 = arith.constant 0 : index
    %c2404 = arith.constant 2404 : index
    %19 = vector.load %arg5[%c0_19, %c2404] : memref<4x5184xf32, #tpu.memory_space<vmem>>, vector<4x16xf32>
    tpu.vector_store %arg5[%c0_19, %c2404], %18 {strides = array<i32>} : memref<4x5184xf32, #tpu.memory_space<vmem>>, vector<4x16xf32>,
    %c0_20 = arith.constant 0 : index
    %c0_21 = arith.constant 0 : index
    %c96 = arith.constant 96 : index
    %20 = vector.load %arg1[%c0_20, %c0_21, %c96] : memref<1x4x256xf32, #tpu.memory_space<vmem>>, vector<1x4x16xf32>
    %21 = vector.shape_cast %20 : vector<1x4x16xf32> to vector<4x16xf32>
    %c0_22 = arith.constant 0 : index
    %c2476 = arith.constant 2476 : index
    %22 = vector.load %arg5[%c0_22, %c2476] : memref<4x5184xf32, #tpu.memory_space<vmem>>, vector<4x16xf32>
    tpu.vector_store %arg5[%c0_22, %c2476], %21 {strides = array<i32>} : memref<4x5184xf32, #tpu.memory_space<vmem>>, vector<4x16xf32>,
    %c0_23 = arith.constant 0 : index
    %c0_24 = arith.constant 0 : index
    %c112 = arith.constant 112 : index
    %23 = vector.load %arg1[%c0_23, %c0_24, %c112] : memref<1x4x256xf32, #tpu.memory_space<vmem>>, vector<1x4x16xf32>
    %24 = vector.shape_cast %23 : vector<1x4x16xf32> to vector<4x16xf32>
    %c0_25 = arith.constant 0 : index
    %c2548 = arith.constant 2548 : index
    %25 = vector.load %arg5[%c0_25, %c2548] : memref<4x5184xf32, #tpu.memory_space<vmem>>, vector<4x16xf32>
    tpu.vector_store %arg5[%c0_25, %c2548], %24 {strides = array<i32>} : memref<4x5184xf32, #tpu.memory_space<vmem>>, vector<4x16xf32>,
    %c0_26 = arith.constant 0 : index
    %c0_27 = arith.constant 0 : index
    %c128 = arith.constant 128 : index
    %26 = vector.load %arg1[%c0_26, %c0_27, %c128] : memref<1x4x256xf32, #tpu.memory_space<vmem>>, vector<1x4x16xf32>
    %27 = vector.shape_cast %26 : vector<1x4x16xf32> to vector<4x16xf32>
    %c0_28 = arith.constant 0 : index
    %c2620 = arith.constant 2620 : index
    %28 = vector.load %arg5[%c0_28, %c2620] : memref<4x5184xf32, #tpu.memory_space<vmem>>, vector<4x16xf32>
    tpu.vector_store %arg5[%c0_28, %c2620], %27 {strides = array<i32>} : memref<4x5184xf32, #tpu.memory_space<vmem>>, vector<4x16xf32>,
    %c0_29 = arith.constant 0 : index
    %c0_30 = arith.constant 0 : index
    %c144 = arith.constant 144 : index
    %29 = vector.load %arg1[%c0_29, %c0_30, %c144] : memref<1x4x256xf32, #tpu.memory_space<vmem>>, vector<1x4x16xf32>
    %30 = vector.shape_cast %29 : vector<1x4x16xf32> to vector<4x16xf32>
    %c0_31 = arith.constant 0 : index
    %c2692 = arith.constant 2692 : index
    %31 = vector.load %arg5[%c0_31, %c2692] : memref<4x5184xf32, #tpu.memory_space<vmem>>, vector<4x16xf32>
    tpu.vector_store %arg5[%c0_31, %c2692], %30 {strides = array<i32>} : memref<4x5184xf32, #tpu.memory_space<vmem>>, vector<4x16xf32>,
    %c0_32 = arith.constant 0 : index
    %c0_33 = arith.constant 0 : index
    %c160 = arith.constant 160 : index
    %32 = vector.load %arg1[%c0_32, %c0_33, %c160] : memref<1x4x256xf32, #tpu.memory_space<vmem>>, vector<1x4x16xf32>
    %33 = vector.shape_cast %32 : vector<1x4x16xf32> to vector<4x16xf32>
    %c0_34 = arith.constant 0 : index
    %c2764 = arith.constant 2764 : index
    %34 = vector.load %arg5[%c0_34, %c2764] : memref<4x5184xf32, #tpu.memory_space<vmem>>, vector<4x16xf32>
    tpu.vector_store %arg5[%c0_34, %c2764], %33 {strides = array<i32>} : memref<4x5184xf32, #tpu.memory_space<vmem>>, vector<4x16xf32>,
    %c0_35 = arith.constant 0 : index
    %c0_36 = arith.constant 0 : index
    %c176 = arith.constant 176 : index
    %35 = vector.load %arg1[%c0_35, %c0_36, %c176] : memref<1x4x256xf32, #tpu.memory_space<vmem>>, vector<1x4x16xf32>
    %36 = vector.shape_cast %35 : vector<1x4x16xf32> to vector<4x16xf32>
    %c0_37 = arith.constant 0 : index
    %c2836 = arith.constant 2836 : index
    %37 = vector.load %arg5[%c0_37, %c2836] : memref<4x5184xf32, #tpu.memory_space<vmem>>, vector<4x16xf32>
    tpu.vector_store %arg5[%c0_37, %c2836], %36 {strides = array<i32>} : memref<4x5184xf32, #tpu.memory_space<vmem>>, vector<4x16xf32>,
    %c0_38 = arith.constant 0 : index
    %c0_39 = arith.constant 0 : index
    %c192 = arith.constant 192 : index
    %38 = vector.load %arg1[%c0_38, %c0_39, %c192] : memref<1x4x256xf32, #tpu.memory_space<vmem>>, vector<1x4x16xf32>
    %39 = vector.shape_cast %38 : vector<1x4x16xf32> to vector<4x16xf32>
    %c0_40 = arith.constant 0 : index
    %c2908 = arith.constant 2908 : index
    %40 = vector.load %arg5[%c0_40, %c2908] : memref<4x5184xf32, #tpu.memory_space<vmem>>, vector<4x16xf32>
    tpu.vector_store %arg5[%c0_40, %c2908], %39 {strides = array<i32>} : memref<4x5184xf32, #tpu.memory_space<vmem>>, vector<4x16xf32>,
    %c0_41 = arith.constant 0 : index
    %c0_42 = arith.constant 0 : index
    %c208 = arith.constant 208 : index
    %41 = vector.load %arg1[%c0_41, %c0_42, %c208] : memref<1x4x256xf32, #tpu.memory_space<vmem>>, vector<1x4x16xf32>
    %42 = vector.shape_cast %41 : vector<1x4x16xf32> to vector<4x16xf32>
    %c0_43 = arith.constant 0 : index
    %c2980 = arith.constant 2980 : index
    %43 = vector.load %arg5[%c0_43, %c2980] : memref<4x5184xf32, #tpu.memory_space<vmem>>, vector<4x16xf32>
    tpu.vector_store %arg5[%c0_43, %c2980], %42 {strides = array<i32>} : memref<4x5184xf32, #tpu.memory_space<vmem>>, vector<4x16xf32>,
    %c0_44 = arith.constant 0 : index
    %c0_45 = arith.constant 0 : index
    %c224 = arith.constant 224 : index
    %44 = vector.load %arg1[%c0_44, %c0_45, %c224] : memref<1x4x256xf32, #tpu.memory_space<vmem>>, vector<1x4x16xf32>
    %45 = vector.shape_cast %44 : vector<1x4x16xf32> to vector<4x16xf32>
    %c0_46 = arith.constant 0 : index
    %c3052 = arith.constant 3052 : index
    %46 = vector.load %arg5[%c0_46, %c3052] : memref<4x5184xf32, #tpu.memory_space<vmem>>, vector<4x16xf32>
    tpu.vector_store %arg5[%c0_46, %c3052], %45 {strides = array<i32>} : memref<4x5184xf32, #tpu.memory_space<vmem>>, vector<4x16xf32>,
    %c0_47 = arith.constant 0 : index
    %c0_48 = arith.constant 0 : index
    %c240 = arith.constant 240 : index
    %47 = vector.load %arg1[%c0_47, %c0_48, %c240] : memref<1x4x256xf32, #tpu.memory_space<vmem>>, vector<1x4x16xf32>
    %48 = vector.shape_cast %47 : vector<1x4x16xf32> to vector<4x16xf32>
    %c0_49 = arith.constant 0 : index
    %c3124 = arith.constant 3124 : index
    %49 = vector.load %arg5[%c0_49, %c3124] : memref<4x5184xf32, #tpu.memory_space<vmem>>, vector<4x16xf32>
    tpu.vector_store %arg5[%c0_49, %c3124], %48 {strides = array<i32>} : memref<4x5184xf32, #tpu.memory_space<vmem>>, vector<4x16xf32>,
    %c0_50 = arith.constant 0 : index
    %c0_51 = arith.constant 0 : index
    %50 = vector.load %arg2[%c0_50, %c0_51] : memref<8x4xf32, #tpu.memory_space<vmem>>, vector<8x4xf32>
    %c0_52 = arith.constant 0 : index
    %c0_53 = arith.constant 0 : index
    %51 = vector.load %arg3[%c0_52, %c0_53] : memref<8x1xf32, #tpu.memory_space<vmem>>, vector<8x1xf32>
    %52 = vector.shape_cast %51 : vector<8x1xf32> to vector<8x1xf32>
    %53 = vector.broadcast %52 : vector<8x1xf32> to vector<8x5184xf32>
    %54 = vector.extract_strided_slice %50 {offsets = [0, 0], sizes = [8, 1], strides = [1, 1]} : vector<8x4xf32> to vector<8x1xf32>
    %c0_54 = arith.constant 0 : index
    %c0_55 = arith.constant 0 : index
    %55 = vector.load %arg5[%c0_54, %c0_55] : memref<4x5184xf32, #tpu.memory_space<vmem>>, vector<1x5184xf32>
    %56 = vector.broadcast %54 : vector<8x1xf32> to vector<8x5184xf32>
    %57 = vector.broadcast %55 : vector<1x5184xf32> to vector<8x5184xf32>
    %58 = arith.mulf %56, %57 : vector<8x5184xf32>
    %59 = arith.addf %53, %58 : vector<8x5184xf32>
    %60 = vector.extract_strided_slice %50 {offsets = [0, 1], sizes = [8, 1], strides = [1, 1]} : vector<8x4xf32> to vector<8x1xf32>
    %c1 = arith.constant 1 : index
    %c0_56 = arith.constant 0 : index
    %61 = vector.load %arg5[%c1, %c0_56] : memref<4x5184xf32, #tpu.memory_space<vmem>>, vector<1x5184xf32>
    %62 = vector.broadcast %60 : vector<8x1xf32> to vector<8x5184xf32>
    %63 = vector.broadcast %61 : vector<1x5184xf32> to vector<8x5184xf32>
    %64 = arith.mulf %62, %63 : vector<8x5184xf32>
    %65 = arith.addf %59, %64 : vector<8x5184xf32>
    %66 = vector.extract_strided_slice %50 {offsets = [0, 2], sizes = [8, 1], strides = [1, 1]} : vector<8x4xf32> to vector<8x1xf32>
    %c2 = arith.constant 2 : index
    %c0_57 = arith.constant 0 : index
    %67 = vector.load %arg5[%c2, %c0_57] : memref<4x5184xf32, #tpu.memory_space<vmem>>, vector<1x5184xf32>
    %68 = vector.broadcast %66 : vector<8x1xf32> to vector<8x5184xf32>
    %69 = vector.broadcast %67 : vector<1x5184xf32> to vector<8x5184xf32>
    %70 = arith.mulf %68, %69 : vector<8x5184xf32>
    %71 = arith.addf %65, %70 : vector<8x5184xf32>
    %72 = vector.extract_strided_slice %50 {offsets = [0, 3], sizes = [8, 1], strides = [1, 1]} : vector<8x4xf32> to vector<8x1xf32>
    %c3 = arith.constant 3 : index
    %c0_58 = arith.constant 0 : index
    %73 = vector.load %arg5[%c3, %c0_58] : memref<4x5184xf32, #tpu.memory_space<vmem>>, vector<1x5184xf32>
    %74 = vector.broadcast %72 : vector<8x1xf32> to vector<8x5184xf32>
    %75 = vector.broadcast %73 : vector<1x5184xf32> to vector<8x5184xf32>
    %76 = arith.mulf %74, %75 : vector<8x5184xf32>
    %77 = arith.addf %71, %76 : vector<8x5184xf32>
    %c0_59 = arith.constant 0 : index
    %c0_60 = arith.constant 0 : index
    %c0_61 = arith.constant 0 : index
    %78 = vector.load %arg4[%c0_59, %c0_60, %c0_61] : memref<1x8x5184xf32, #tpu.memory_space<vmem>>, vector<1x8x5184xf32>
    %79 = vector.shape_cast %78 : vector<1x8x5184xf32> to vector<8x5184xf32>
    %80 = vector.shape_cast %77 : vector<8x5184xf32> to vector<1x8x5184xf32>
    tpu.vector_store %arg4[%c0_59, %c0_60, %c0_61], %80 {strides = array<i32>} : memref<1x8x5184xf32, #tpu.memory_space<vmem>>, vector<1x8x5184xf32>,
    return
  }
  func.func @transform_0(%arg0: i32) -> (i32, i32, i32) {
    %c0_i32 = arith.constant 0 : i32
    %c0_i32_0 = arith.constant 0 : i32
    %c0_i32_1 = arith.constant 0 : i32
    return %arg0, %c0_i32, %c0_i32_0 : i32, i32, i32
  }
  func.func @transform_1(%arg0: i32) -> (i32, i32) {
    %c0_i32 = arith.constant 0 : i32
    %c0_i32_0 = arith.constant 0 : i32
    %c0_i32_1 = arith.constant 0 : i32
    return %c0_i32, %c0_i32_0 : i32, i32
  }
  func.func @transform_2(%arg0: i32) -> (i32, i32) {
    %c0_i32 = arith.constant 0 : i32
    %c0_i32_0 = arith.constant 0 : i32
    %c0_i32_1 = arith.constant 0 : i32
    return %c0_i32, %c0_i32_0 : i32, i32
  }
  func.func @transform_3(%arg0: i32) -> (i32, i32, i32) {
    %c0_i32 = arith.constant 0 : i32
    %c0_i32_0 = arith.constant 0 : i32
    %c0_i32_1 = arith.constant 0 : i32
    return %arg0, %c0_i32, %c0_i32_0 : i32, i32, i32
  }
}

</mosaic_0001>

<bundles_post_ra>
// kernel: tpu_custom_call.1
= control target key start
LH: loop header
LB: loop body
LE: loop exit
PB: predicated region body
PF: predicated region fallthrough
CT: control target
= control target key end

     0   :  { %8 = vsyncpa [#allocation4], 0  ;;  %s2374_s0 = inlined_call_operand.vmem [shape: f32[2,4,256], index: 0, kind: input, shape index: {}]   ;;  %s2375_s1 = inlined_call_operand.vmem [shape: f32[8,4], index: 1, kind: input, shape index: {}]   ;;  %s2376_s2 = inlined_call_operand.vmem [shape: f32[8,1], index: 2, kind: input, shape index: {}]   ;;  %s2377_s3 = inlined_call_operand.hbm [shape: f32[2,8,5184], index: 3, kind: output, shape index: {}]  }
   0x1   :  { %10 = vsyncpa [#allocation4 + $0x1], 0  ;;  %s1369_s12 = smov 0   ;;  %s1371_s13 = smov 0  }
   0x2   :  { %s1373_s14 = smov 0   ;;  %s1375_s15 = smov 0  }
   0x3 LB: > { %s1390_s16 = sadd.s32 4294967295, %s1326_s15   ;;  %s1182_s17 = sadd.s32 4294967294, %s1326_s15   ;;  %s1326_s15 = sphi %s1375_s15, %s2624_s15   ;;  %s1322_s14 = sphi %s1373_s14, %s2623_s14   ;;  %s1318_s13 = sphi %s1371_s13, %s2622_s13   ;;  %s1314_s12 = sphi %s1369_s12, %s2621_s12  }
   0x4   : > { %s1394_s18 = sadd.s32 1, %s1326_s15   ;;  %s91_s19 = sadd.s32 1, %s1322_s14 }
   0x5   : > { %s88_s20 = ssub.s32 %s1326_s15, %s1394_s18  ;;  %p101_p0 = scmp.ne.s32.totalorder %s1322_s14, %s1318_s13 }
   0x6   : > { %p89_p1 = scmp.eq.s32.totalorder %s88_s20, 0  ;;  %p102_p2 = scmp.eq.s32.totalorder %s1390_s16, 1 }
   0x7   : > { %p107_p3 = scmp.ne.s32.totalorder %s1318_s13, %s1314_s12  ;;  %p108_p4 = scmp.eq.s32.totalorder %s1182_s17, 1 }
   0x8   : > { %s1405_s21 = scalar_select %p89_p1, %s1322_s14, %s91_s19  }
   0x9   : > { %p1407_p5 = por %p102_p2, %p101_p0  ;;  %p1411_p6 = por %p108_p4, %p107_p3 }
   0xa   : > { %p1185_p7 = scmp.ge.s32.totalorder %s1326_s15, 1  ;;  %p140_p8 = scmp.lt.s32.totalorder %s1326_s15, 3 }
   0xc   : > { %p141_p9 = pnand %p1185_p7, %p140_p8 }
   0xe   : > { %144 = sbr.rel (%p141_p9) target bundleno = 317 (0x13d), region = 32 }
  0x13   : > { %p164_p10 = scmp.lt.s32.totalorder %s1390_s16, 1  ;;  %s1328_s29 = smov 92   ;;  %v1331_v6 = vmov 0   ;;  %v1335_v7 = vmov 1   ;;  %v1339_v11 = vmov 0.0   ;;  %v314_v18 = vld [vmem:[%s2376_s2] sm:$0xff] }
  0x14   : > { %s1329_s30 = smov 108   ;;  %s1330_s4 = smov 124   ;;  %1255 = vset.pattern.permute.xlu2 %v1331_v6  ;;  %1254 = vset.pattern.permute.xlu1 %v1331_v6  ;;  %178 = vst [vmem:[#allocation2 + $0x48] sm:$0xff] %v1339_v11  ;;  %v313_v19 = vld [vmem:[%s2375_s1] sm:$0xff]  ;;  %v1347_v21 = vmov 3   ;;  %v1348_v22 = vmov 2  }
  0x15   : > { %s165_s24 = scalar_select %p164_p10, %s1390_s16, 1  ;;  %1256 = vset.pattern.permute.xlu0 %v1335_v7  ;;  %169 = vst [vmem:[#allocation2] sm:$0xff] %v1339_v11  ;;  %vm229_vm0 = vcmask 355552   ;;  %vm283_vm1 = vcmask 289952   ;;  %vm189_vm2 = vcmask 519168   ;;  %vm215_vm3 = vcmask 224352  }
  0x16   : > { %s1332_s5 = smov 4   ;;  %s1333_s6 = smov 36   ;;  %170 = vst [vmem:[#allocation2 + $0x8] sm:$0xff] %v1339_v11  ;;  %vm199_vm4 = vcmask 1044448   ;;  %vm200_vm5 = vcmask 97284   ;;  %vm196_vm6 = vcmask 1014784  }
  0x17   : > { %s1191_s25 = sshll.u32 %s165_s24, 3  ;;  %s1334_s7 = smov 52   ;;  %171 = vst [vmem:[#allocation2 + $0x10] sm:$0xff] %v1339_v11  ;;  %vm201_vm7 = vmor %vm200_vm5, %vm199_vm4  ;;  %vm222_vm8 = vcmask 814752   ;;  %vm208_vm9 = vcmask 683552   ;;  %vm250_vm10 = vcmask 31744  }
  0x18   : > { %s1422_s28 = scalar_lea.vmem %s2374_s0, %s1191_s25  ;;  %s1336_s8 = smov 100   ;;  %172 = vst [vmem:[#allocation2 + $0x18] sm:$0xff] %v1339_v11  ;;  %vm253_vm11 = vcmask 1044384   ;;  %vm254_vm12 = vcmask 31748   ;;  %vm269_vm13 = vcmask 158752   ;;  %vm243_vm14 = vcmask 486752  }
  0x19   : > { %v224_v0 = vld [vmem:[%s1422_s28] sm:$0xf]  ;;  %v278_v8 = vld [vmem:[%s1422_s28 + $0x4] sm:$0xf]  ;;  %s1337_s9 = smov 116   ;;  %s1338_s10 = smov 76   ;;  %vm255_vm15 = vmor %vm254_vm12, %vm253_vm11 }
  0x1a   : > { %v210_v1 = vld [vmem:[%s1422_s28] sm:$0xf]  ;;  %226 = vrot.lane.b32.xlu2 %v224_v0, %s1328_s29  ;;  %v264_v9 = vld [vmem:[%s1422_s28 + $0x4] sm:$0xf]  ;;  %s1340_s11 = smov 60   ;;  %s1341_s17 = smov 20  }
  0x1b   : > { %v191_v2 = vld [vmem:[%s1422_s28] sm:$0xf]  ;;  %212 = vrot.lane.b32.xlu1 %v210_v1, %s1329_s30  ;;  %v257_v12 = vld [vmem:[%s1422_s28 + $0x4] sm:$0xf]  ;;  %173 = vst [vmem:[#allocation2 + $0x20] sm:$0xff] %v1339_v11  ;;  %s1342_s19 = smov 84  }
  0x1c   : > { %193 = vrot.lane.b32.xlu0 %v191_v2, %s1330_s4  ;;  %v245_v3 = vld [vmem:[%s1422_s28] sm:$0xf]  ;;  %v292_v14 = vld [vmem:[%s1422_s28 + $0x4] sm:$0xf]  ;;  %174 = vst [vmem:[#allocation2 + $0x28] sm:$0xff] %v1339_v11  ;;  %s1343_s20 = smov 12  }
  0x1d   : > { %v217_v4 = vld [vmem:[%s1422_s28] sm:$0xf]  ;;  %175 = vst [vmem:[#allocation2 + $0x30] sm:$0xff] %v1339_v11  ;;  %v299_v15 = vld [vmem:[%s1422_s28 + $0x4] sm:$0xf]  ;;  %s1344_s24 = smov 28  }
  0x1e   : > { %v203_v5 = vld [vmem:[%s1422_s28] sm:$0xf]  ;;  %176 = vst [vmem:[#allocation2 + $0x38] sm:$0xff] %v1339_v11  ;;  %v285_v16 = vld [vmem:[%s1422_s28 + $0x4] sm:$0xf]  ;;  %s1345_s25 = smov 44  }
  0x1f   : > { %v238_v10 = vld [vmem:[%s1422_s28] sm:$0xf]  ;;  %177 = vst [vmem:[#allocation2 + $0x40] sm:$0xff] %v1339_v11  ;;  %v271_v17 = vld [vmem:[%s1422_s28 + $0x4] sm:$0xf]  ;;  %s1346_s4 = smov 68  }
  0x20   : > { %v231_v13 = vld [vmem:[%s1422_s28] sm:$0xf]  ;;  %179 = vst [vmem:[#allocation2 + $0x50] sm:$0xff] %v1339_v11  ;;  %v306_v20 = vld [vmem:[%s1422_s28 + $0x4] sm:$0xf]  ;;  %vm290_vm4 = vcmask 880352  }
  0x21   : > { %180 = vst [vmem:[#allocation2 + $0x58] sm:$0xff] %v1339_v11  ;;  %vm276_vm5 = vcmask 749152   ;;  %v1446_v42 = vld [vmem:[#allocation2 + $0x3] ss:$4 sm:$0xff]  ;;  %s161_s28 = sand.u32 1, %s1318_s13   ;;  %s1284_s26 = scalar_lea.hbm %s2377_s3, 656 }
  0x22   : > { %247 = vrot.lane.b32.xlu2 %v245_v3, %s1332_s5  ;;  %181 = vst [vmem:[#allocation2 + $0x60] sm:$0xff] %v1339_v11  ;;  %v900_v45 = vperm.slane %v1446_v42, 0  ;;  %v901_v46 = vperm.slane %v1446_v42, 1  ;;  %v902_v47 = vperm.slane %v1446_v42, 2  ;;  %v903_v48 = vperm.slane %v1446_v42, 3  ;;  %s1192_s5 = smul.u32 328, %s161_s28 }
  0x23   : > { %219 = vrot.lane.b32.xlu1 %v217_v4, %s1333_s6  ;;  %182 = vst [vmem:[#allocation2 + $0x68] sm:$0xff] %v1339_v11  ;;  %v904_v51 = vperm.slane %v1446_v42, 4  ;;  %v905_v52 = vperm.slane %v1446_v42, 5  ;;  %v906_v53 = vperm.slane %v1446_v42, 6  ;;  %v907_v54 = vperm.slane %v1446_v42, 7 }
  0x24   : > { %205 = vrot.lane.b32.xlu0 %v203_v5, %s1334_s7  ;;  %183 = vst [vmem:[#allocation2 + $0x70] sm:$0xff] %v1339_v11  ;;  %s2090_s6 = scalar_lea.vmem [#allocation3], %s1192_s5  ;;  %s1193_s7 = smul.u32 328, %s1390_s16 }
  0x25   : > { %184 = vst [vmem:[#allocation2 + $0x78] sm:$0xff] %v1339_v11 }
  0x26   : > { %185 = vst [vmem:[#allocation2 + $0x80] sm:$0xff] %v1339_v11 }
  0x27   : > { %186 = vst [vmem:[#allocation2 + $0x88] sm:$0xff] %v1339_v11 }
  0x28   : > { %187 = vst [vmem:[#allocation2 + $0x90] sm:$0xff] %v1339_v11 }
  0x29   : > { %188 = vst [vmem:[#allocation2 + $0x98] sm:$0xff] %v1339_v11 }
  0x2a   : > { %280 = vrot.lane.b32.xlu2 %v278_v8, %s1336_s8  ;;  %190 = vst.msk [vmem:[#allocation2 + $0xa0] sm:$0xf] %vm189_vm2, %v1339_v11  ;;  %vm297_vm2 = vcmask 421152  }
  0x2b   : > { %266 = vrot.lane.b32.xlu1 %v264_v9, %s1337_s9  ;;  %s1118_s9 = scalar_lea.hbm %s2377_s3, %s1193_s7 }
  0x2c   : > { %240 = vrot.lane.b32.xlu0 %v238_v10, %s1338_s10  ;;  %s1120_s10 = sshll.u32 %s2090_s6, 4  ;;  %s1121_s10 = int_to_ptr.vmem [resolvable:$true] %s1120_s10 }
  0x30   : > { %v1448_v44 = vld [vmem:[#allocation2 + $0x83] ss:$4 sm:$0xff] }
  0x31   : > { %2388 = vst [vmem:[#allocation6_spill] sm:$0xff] %v1448_v44  ;;  %v932_v55 = vperm.slane %v1448_v44, 0  ;;  %v933_v56 = vperm.slane %v1448_v44, 1  ;;  %v934_v57 = vperm.slane %v1448_v44, 2  ;;  %v935_v58 = vperm.slane %v1448_v44, 3 }
  0x32   : > { %259 = vrot.lane.b32.xlu2 %v257_v12, %s1340_s11  ;;  %v936_v60 = vperm.slane %v1448_v44, 4  ;;  %s1122_s11 = sshll.u32 %s1118_s9, 4  ;;  %s1123_s11 = int_to_ptr.hbm [resolvable:$true] %s1122_s11 }
  0x33   : > { %233 = vrot.lane.b32.xlu1 %v231_v13, %s1341_s17  ;;  %s1107_s17 = scalar_lea.sflag [#allocation4], %s161_s28 }
  0x34   : > { %294 = vrot.lane.b32.xlu0 %v292_v14, %s1342_s19  ;;  %s1278_s19 = sshra.s32 %s1123_s11, 4  ;;  %s1279_s19 = int_to_ptr.hbm [resolvable:$true] %s1278_s19 }
  0x35   : > { %p1285_p0 = scmp.lt.s32.totalorder %s1279_s19, %s2377_s3 }
  0x3a   : > { %301 = vrot.lane.b32.xlu2 %v299_v15, %s1343_s20  ;;  %s1280_s20 = scalar_lea.hbm %s1279_s19, 328 }
  0x3b   : > { %287 = vrot.lane.b32.xlu1 %v285_v16, %s1344_s24  ;;  %p1281_p11 = scmp.ne.s32.totalorder %s1279_s19, %s1280_s20  ;;  %p1286_p1 = scmp.lt.s32.totalorder %s1284_s26, %s1280_s20 }
  0x3c   : > { %273 = vrot.lane.b32.xlu0 %v271_v17, %s1345_s25 }
  0x3d   : > { %p1282_p12 = pnand %p1281_p11, %p1407_p5  ;;  %p1287_p2 = por %p1286_p1, %p1285_p0 }
  0x3f   : > { %p1283_p13 = pneg %p1282_p12 }
  0x41   : > { %p1288_p3 = pnand %p1287_p2, %p1283_p13 }
  0x42   : > { %317 = vperm.xlu2 %1255, %v314_v18  }
  0x43   : > { %333 = vperm.xlu1 %1254, %v313_v19  }
  0x44   : > { %308 = vrot.lane.b32.xlu0 %v306_v20, %s1346_s4 }
  0x4a   : > { %1258 = vset.pattern.permute.xlu2 %v1347_v21 }
  0x4b   : > { %1257 = vset.pattern.permute.xlu1 %v1348_v22  ;;  %891 = vperm.xlu2 %1258, %v313_v19  }
  0x4c   : > { %519 = vperm.xlu0 %1256, %v313_v19   ;;  %705 = vperm.xlu1 %1257, %v313_v19  }
  0x54   : > { %1259 = vset.pattern.permute.xlu0 %v1347_v21 }
  0x74   : > { %v227_v23 = vpop.permute.xlu2 %226 }
  0x75   : > { %230 = vst.msk [vmem:[#allocation2 + $0x48] sm:$0xf] %vm229_vm0, %v227_v23  ;;  %vm262_vm0 = vcmask 617952  }
  0x7c   : > { %v248_v24 = vpop.permute.xlu2 %247 }
  0x7d   : > { %v249_v32 = vrot.slane %v248_v24, 4 }
  0x7f   : > { %v251_v33 = vsel %vm250_vm10, %v249_v32, %v248_v24 }
  0x84   : > { %v281_v25 = vpop.permute.xlu2 %280 }
  0x85   : > { %284 = vst.msk [vmem:[#allocation2 + $0x58] sm:$0xf] %vm283_vm1, %v281_v25  ;;  %vm236_vm1 = vcmask 945952  }
  0x8c   : > { %v260_v34 = vpop.permute.xlu2 %259 }
  0x8d   : > { %v213_v26 = vpop.permute.xlu1 %212 }
  0x8e   : > { %216 = vst.msk [vmem:[#allocation2 + $0x44] sm:$0xf] %vm215_vm3, %v213_v26  ;;  %v194_v27 = vpop.permute.xlu0 %193  ;;  %vm304_vm3 = vcmask 1011552  }
  0x8f   : > { %v195_v28 = vrot.slane %v194_v27, 4 }
  0x91   : > { %v197_v29 = vsel %vm196_vm6, %v195_v28, %v194_v27  ;;  %vm311_vm6 = vcmask 552352  }
  0x92   : > { %202 = vst.msk [vmem:[#allocation2 + $0x3c] sm:$0xff] %vm201_vm7, %v197_v29  ;;  %vm1104_vm7 = vcmask 523264  }
  0x94   : > { %v302_v39 = vpop.permute.xlu2 %301 }
  0x95   : > { %v220_v30 = vpop.permute.xlu1 %219 }
  0x96   : > { %223 = vst.msk [vmem:[#allocation2 + $0x44] sm:$0xf] %vm222_vm8, %v220_v30  ;;  %v206_v31 = vpop.permute.xlu0 %205 }
  0x97   : > { %209 = vst.msk [vmem:[#allocation2 + $0x40] sm:$0xf] %vm208_vm9, %v206_v31 }
  0x99   : > { %v1454_v49 = vld [vmem:[#allocation2 + $0x20] ss:$4 sm:$0xff]  ;;  %v1466_v59 = vld [vmem:[#allocation2 + $0x21] ss:$4 sm:$0xff]  ;;  %v1480_v8 = vld [vmem:[#allocation2 + $0x22] ss:$4 sm:$0xff] }
  0x9a   : > { %v881_v17 = vld [vmem:[#allocation2 + $0x23] ss:$4 sm:$0xff] }
  0x9b   : > { %v908_v26 = vperm.slane %v881_v17, 0  ;;  %v909_v27 = vperm.slane %v881_v17, 1  ;;  %v910_v28 = vperm.slane %v881_v17, 2  ;;  %v911_v29 = vperm.slane %v881_v17, 3 }
  0x9c   : > { %v1456_v50 = vpop.permute.xlu2 %317  ;;  %v912_v30 = vperm.slane %v881_v17, 4  ;;  %v913_v31 = vperm.slane %v881_v17, 5  ;;  %v914_v32 = vperm.slane %v881_v17, 6 }
  0x9d   : > { %v267_v35 = vpop.permute.xlu1 %266 }
  0x9e   : > { %270 = vst.msk [vmem:[#allocation2 + $0x54] sm:$0xf] %vm269_vm13, %v267_v35  ;;  %v241_v36 = vpop.permute.xlu0 %240 }
  0x9f   : > { %244 = vst.msk [vmem:[#allocation2 + $0x4c] sm:$0xf] %vm243_vm14, %v241_v36 }
  0xa0   : > { %256 = vst.msk [vmem:[#allocation2 + $0x4c] sm:$0xff] %vm255_vm15, %v251_v33  ;;  %v915_v33 = vperm.slane %v881_v17, 7 }
  0xa1   : > { %263 = vst.msk [vmem:[#allocation2 + $0x50] sm:$0xf] %vm262_vm0, %v260_v34 }
  0xa5   : > { %v234_v37 = vpop.permute.xlu1 %233  ;;  %v1498_v34 = vpop.permute.xlu2 %891 }
  0xa6   : > { %237 = vst.msk [vmem:[#allocation2 + $0x48] sm:$0xf] %vm236_vm1, %v234_v37  ;;  %v295_v38 = vpop.permute.xlu0 %294  ;;  %v1501_v35 = vmul.f32 %v900_v45, %v1498_v34  ;;  %v1504_v36 = vmul.f32 %v901_v46, %v1498_v34  ;;  %v1507_v37 = vmul.f32 %v902_v47, %v1498_v34  ;;  %v1522_v42 = vmul.f32 %v907_v54, %v1498_v34 }
  0xa7   : > { %298 = vst.msk [vmem:[#allocation2 + $0x5c] sm:$0xf] %vm297_vm2, %v295_v38  ;;  %v1510_v38 = vmul.f32 %v903_v48, %v1498_v34  ;;  %v1528_v45 = vmul.f32 %v909_v27, %v1498_v34  ;;  %v1531_v46 = vmul.f32 %v910_v28, %v1498_v34  ;;  %v1534_v47 = vmul.f32 %v911_v29, %v1498_v34  ;;  %v1536_v48 = vld [vmem:[#allocation2] ss:$4 sm:$0xff] }
  0xa8   : > { %305 = vst.msk [vmem:[#allocation2 + $0x5c] sm:$0xf] %vm304_vm3, %v302_v39  ;;  %v1513_v39 = vmul.f32 %v904_v51, %v1498_v34  ;;  %v1539_v51 = vmul.f32 %v912_v30, %v1498_v34  ;;  %v1548_v54 = vmul.f32 %v915_v33, %v1498_v34  ;;  %v1551_v17 = vmul.f32 %v932_v55, %v1498_v34  ;;  %v1562_v29 = vld [vmem:[#allocation2 + $0x80] ss:$4 sm:$0xff] }
  0xa9   : > { %2389 = vst [vmem:[#allocation7_spill] sm:$0xff] %v1498_v34  ;;  %v1557_v27 = vmul.f32 %v934_v57, %v1498_v34  ;;  %v1560_v28 = vmul.f32 %v935_v58, %v1498_v34  ;;  %v1565_v30 = vmul.f32 %v936_v60, %v1498_v34  ;;  %v344_v55 = vperm.slane %v1536_v48, 2 }
  0xaa   : > { %2390 = vst [vmem:[#allocation8_spill] sm:$0xff] %v1501_v35 }
  0xab   : > { %2391 = vst [vmem:[#allocation9_spill] sm:$0xff] %v1504_v36  ;;  %v1262_v36 = vld [vmem:[#allocation2 + $0xa1] ss:$0 sm:$0xff] }
  0xac   : > { %2392 = vst [vmem:[#allocation10_spill] sm:$0xff] %v1507_v37 }
  0xad   : > { %v288_v40 = vpop.permute.xlu1 %287  ;;  %2393 = vst [vmem:[#allocation11_spill] sm:$0xff] %v1510_v38 }
  0xae   : > { %291 = vst.msk [vmem:[#allocation2 + $0x58] sm:$0xf] %vm290_vm4, %v288_v40  ;;  %v274_v41 = vpop.permute.xlu0 %273  ;;  %v1516_v40 = vmul.f32 %v905_v52, %v1498_v34  ;;  %v1542_v52 = vmul.f32 %v913_v31, %v1498_v34  ;;  %v342_v31 = vperm.slane %v1536_v48, 0 }
  0xaf   : > { %277 = vst.msk [vmem:[#allocation2 + $0x54] sm:$0xf] %vm276_vm5, %v274_v41  ;;  %v1519_v41 = vmul.f32 %v906_v53, %v1498_v34  ;;  %v1545_v53 = vmul.f32 %v914_v32, %v1498_v34  ;;  %v343_v32 = vperm.slane %v1536_v48, 1 }
  0xb0   : > { %2394 = vst [vmem:[#allocation12_spill] sm:$0xff] %v1513_v39 }
  0xb1   : > { %2395 = vst [vmem:[#allocation13_spill] sm:$0xff] %v1516_v40  ;;  %v2481_v40 = vperm.slane %v1466_v59, 3 }
  0xb2   : > { %2396 = vst [vmem:[#allocation14_spill] sm:$0xff] %v1519_v41  ;;  %v2480_v41 = vperm.slane %v1466_v59, 2 }
  0xb3   : > { %2397 = vst [vmem:[#allocation15_spill] sm:$0xff] %v1522_v42  ;;  %v2479_v42 = vperm.slane %v1466_v59, 1 }
  0xb4   : > { %2399 = vst [vmem:[#allocation17_spill] sm:$0xff] %v1528_v45 }
  0xb5   : > { %2400 = vst [vmem:[#allocation18_spill] sm:$0xff] %v1531_v46  ;;  %v1580_v24 = vpop.permute.xlu1 %333 }
  0xb6   : > { %v309_v43 = vpop.permute.xlu0 %308  ;;  %2401 = vst [vmem:[#allocation19_spill] sm:$0xff] %v1534_v47  ;;  %v1574_v63 = vld [vmem:[#allocation2 + $0x40] ss:$4 sm:$0xff]  ;;  %v1586_v19 = vld [vmem:[#allocation2 + $0x41] ss:$4 sm:$0xff]  ;;  %v1590_v16 = vmul.f32 %v342_v31, %v1580_v24  ;;  %v1593_v15 = vmul.f32 %v343_v32, %v1580_v24  ;;  %v1596_v14 = vmul.f32 %v344_v55, %v1580_v24 }
  0xb7   : > { %312 = vst.msk [vmem:[#allocation2 + $0x60] sm:$0xf] %vm311_vm6, %v309_v43  ;;  %v1525_v43 = vmul.f32 %v908_v26, %v1498_v34  ;;  %v1554_v26 = vmul.f32 %v933_v56, %v1498_v34  ;;  %v345_v56 = vperm.slane %v1536_v48, 3  ;;  %v1608_v20 = vld [vmem:[#allocation2 + $0x42] ss:$4 sm:$0xff]  ;;  %v2496_v38 = vperm.slane %v1586_v19, 7 }
  0xb8   : > { %2402 = vst [vmem:[#allocation20_spill] sm:$0xff] %v1539_v51  ;;  %v883_v61 = vld [vmem:[#allocation2 + $0x43] ss:$4 sm:$0xff] }
  0xb9   : > { %2398 = vst [vmem:[#allocation16_spill] sm:$0xff] %v1525_v43  ;;  %v1602_v10 = vmul.f32 %v345_v56, %v1580_v24  ;;  %v916_v7 = vperm.slane %v883_v61, 0  ;;  %v917_v21 = vperm.slane %v883_v61, 1  ;;  %v918_v6 = vperm.slane %v883_v61, 2 }
  0xba   : > { %2403 = vst [vmem:[#allocation21_spill] sm:$0xff] %v1542_v52  ;;  %v919_v5 = vperm.slane %v883_v61, 3  ;;  %v920_v23 = vperm.slane %v883_v61, 4  ;;  %v921_v4 = vperm.slane %v883_v61, 5  ;;  %v922_v56 = vperm.slane %v883_v61, 6 }
  0xbb   : > { %2404 = vst [vmem:[#allocation22_spill] sm:$0xff] %v1545_v53  ;;  %v923_v3 = vperm.slane %v883_v61, 7  ;;  %v1638_v57 = vmul.f32 %v917_v21, %v1498_v34  ;;  %v1641_v61 = vmul.f32 %v918_v6, %v1498_v34  ;;  %v2460_v53 = vperm.slane %v1562_v29, 3 }
  0xbc   : > { %2405 = vst [vmem:[#allocation23_spill] sm:$0xff] %v1548_v54  ;;  %v2458_v54 = vperm.slane %v1562_v29, 1  ;;  %v2463_v52 = vperm.slane %v1562_v29, 6 }
  0xbd   : > { %2406 = vst [vmem:[#allocation24_spill] sm:$0xff] %v1551_v17  ;;  %v1659_v21 = vmul.f32 %v923_v3, %v1498_v34 }
  0xbe   : > { %2407 = vst [vmem:[#allocation25_spill] sm:$0xff] %v1554_v26  ;;  %v326_v18 = vld [vmem:[#allocation2 + $0x60] ss:$4 sm:$0xff] }
  0xbf   : > { %2408 = vst [vmem:[#allocation26_spill] sm:$0xff] %v1557_v27  ;;  %v366_v9 = vperm.slane %v326_v18, 0  ;;  %v367_v11 = vperm.slane %v326_v18, 1  ;;  %v368_v32 = vperm.slane %v326_v18, 2  ;;  %v369_v12 = vperm.slane %v326_v18, 3 }
  0xc0   : > { %2409 = vst [vmem:[#allocation27_spill] sm:$0xff] %v1560_v28  ;;  %v370_v31 = vperm.slane %v326_v18, 4  ;;  %v371_v13 = vperm.slane %v326_v18, 5  ;;  %v372_v55 = vperm.slane %v326_v18, 6  ;;  %v373_v22 = vperm.slane %v326_v18, 7 }
  0xc1   : > { %2410 = vst [vmem:[#allocation28_spill] sm:$0xff] %v1565_v30  ;;  %v448_v25 = vmul.f32 %v366_v9, %v1580_v24  ;;  %v449_v60 = vmul.f32 %v367_v11, %v1580_v24  ;;  %v450_v2 = vmul.f32 %v368_v32, %v1580_v24  ;;  %v451_v1 = vmul.f32 %v369_v12, %v1580_v24 }
  0xc2   : > { %2411 = vst [vmem:[#allocation29_spill] sm:$0xff] %v1608_v20  ;;  %v452_v0 = vmul.f32 %v370_v31, %v1580_v24  ;;  %v453_v62 = vmul.f32 %v371_v13, %v1580_v24  ;;  %v454_v58 = vmul.f32 %v372_v55, %v1580_v24  ;;  %v1635_v18 = vmul.f32 %v916_v7, %v1498_v34  ;;  %v1656_v31 = vld [vmem:[#allocation2 + $0x61] ss:$4 sm:$0xff] }
  0xc3   : > { %2413 = vst [vmem:[#allocation31_spill] sm:$0xff] %v1638_v57  ;;  %v455_v9 = vmul.f32 %v373_v22, %v1580_v24  ;;  %v1645_v11 = vmul.f32 %v919_v5, %v1498_v34  ;;  %v1648_v12 = vmul.f32 %v920_v23, %v1498_v34  ;;  %v1651_v13 = vmul.f32 %v921_v4, %v1498_v34 }
  0xc4   : > { %2412 = vst [vmem:[#allocation30_spill] sm:$0xff] %v1635_v18  ;;  %v1654_v7 = vmul.f32 %v922_v56, %v1498_v34  ;;  %v1662_v6 = vadd.f32 %v448_v25, %v1456_v50  ;;  %v1665_v5 = vadd.f32 %v449_v60, %v1456_v50  ;;  %v1668_v22 = vadd.f32 %v450_v2, %v1456_v50  ;;  %v885_v25 = vld [vmem:[#allocation2 + $0x63] ss:$4 sm:$0xff] }
  0xc5   : > { %2414 = vst [vmem:[#allocation32_spill] sm:$0xff] %v1641_v61  ;;  %v1671_v4 = vadd.f32 %v451_v1, %v1456_v50  ;;  %v1674_v23 = vadd.f32 %v452_v0, %v1456_v50  ;;  %v1677_v32 = vadd.f32 %v453_v62, %v1456_v50  ;;  %v1680_v3 = vadd.f32 %v454_v58, %v1456_v50  ;;  %v1692_v58 = vld [vmem:[#allocation2 + $0x62] ss:$4 sm:$0xff] }
  0xc6   : > { %2415 = vst [vmem:[#allocation33_spill] sm:$0xff] %v1645_v11  ;;  %v1683_v55 = vadd.f32 %v455_v9, %v1456_v50  ;;  %v924_v9 = vperm.slane %v885_v25, 0  ;;  %v925_v28 = vperm.slane %v885_v25, 1  ;;  %v926_v27 = vperm.slane %v885_v25, 2 }
  0xc7   : > { %2416 = vst [vmem:[#allocation34_spill] sm:$0xff] %v1648_v12  ;;  %v927_v60 = vperm.slane %v885_v25, 3  ;;  %v928_v26 = vperm.slane %v885_v25, 4  ;;  %v929_v2 = vperm.slane %v885_v25, 5  ;;  %v930_v44 = vperm.slane %v885_v25, 6 }
  0xc8   : > { %2417 = vst [vmem:[#allocation35_spill] sm:$0xff] %v1651_v13  ;;  %v931_v62 = vperm.slane %v885_v25, 7  ;;  %v1704_v13 = vmul.f32 %v924_v9, %v1498_v34  ;;  %v1707_v1 = vmul.f32 %v925_v28, %v1498_v34  ;;  %v1710_v56 = vmul.f32 %v926_v27, %v1498_v34 }
  0xc9   : > { %2418 = vst [vmem:[#allocation36_spill] sm:$0xff] %v1654_v7  ;;  %v1713_v25 = vmul.f32 %v927_v60, %v1498_v34  ;;  %v1716_v17 = vmul.f32 %v928_v26, %v1498_v34  ;;  %v1719_v30 = vmul.f32 %v929_v2, %v1498_v34  ;;  %v1722_v7 = vmul.f32 %v930_v44, %v1498_v34 }
  0xca   : > { %2419 = vst [vmem:[#allocation37_spill] sm:$0xff] %v1659_v21  ;;  %v1725_v9 = vmul.f32 %v931_v62, %v1498_v34  ;;  %v2437_v28 = vperm.slane %v1536_v48, 4  ;;  %v2438_v60 = vperm.slane %v1536_v48, 5  ;;  %v2439_v26 = vperm.slane %v1536_v48, 6 }
  0xcb   : > { %2420 = vst [vmem:[#allocation38_spill] sm:$0xff] %v1662_v6  ;;  %v2440_v2 = vperm.slane %v1536_v48, 7  ;;  %v2441_v62 = vperm.slane %v1454_v49, 0  ;;  %v2442_v34 = vperm.slane %v1454_v49, 1  ;;  %v2445_v48 = vperm.slane %v1454_v49, 4 }
  0xcc   : > { %2421 = vst [vmem:[#allocation39_spill] sm:$0xff] %v1665_v5  ;;  %v428_v27 = vmul.f32 %v2437_v28, %v1580_v24  ;;  %v429_v21 = vmul.f32 %v2438_v60, %v1580_v24  ;;  %v430_v33 = vmul.f32 %v2439_v26, %v1580_v24  ;;  %v2454_v61 = vperm.slane %v1574_v63, 5 }
  0xcd   : > { %2422 = vst [vmem:[#allocation40_spill] sm:$0xff] %v1668_v22  ;;  %v431_v44 = vmul.f32 %v2440_v2, %v1580_v24  ;;  %v432_v0 = vmul.f32 %v2441_v62, %v1580_v24  ;;  %v433_v28 = vmul.f32 %v2442_v34, %v1580_v24  ;;  %v436_v2 = vmul.f32 %v2445_v48, %v1580_v24 }
  0xce   : > { %2423 = vst [vmem:[#allocation41_spill] sm:$0xff] %v1671_v4  ;;  %v2450_v48 = vperm.slane %v1574_v63, 1  ;;  %v2456_v57 = vperm.slane %v1574_v63, 7  ;;  %v2457_v18 = vperm.slane %v1562_v29, 0  ;;  %v2478_v20 = vperm.slane %v1466_v59, 0 }
  0xcf   : > { %2424 = vst [vmem:[#allocation42_spill] sm:$0xff] %v1674_v23  ;;  %v2498_v37 = vperm.slane %v1656_v31, 0 }
  0xd0   : > { %2425 = vst [vmem:[#allocation43_spill] sm:$0xff] %v1677_v32  ;;  %v2464_v32 = vperm.slane %v1562_v29, 7 }
  0xd1   : > { %2426 = vst [vmem:[#allocation44_spill] sm:$0xff] %v1680_v3  ;;  %v2462_v3 = vperm.slane %v1562_v29, 5 }
  0xd2   : > { %2427 = vst [vmem:[#allocation45_spill] sm:$0xff] %v1683_v55  ;;  %v2459_v55 = vperm.slane %v1562_v29, 2 }
  0xd3   : > { %2428 = vst [vmem:[#allocation46_spill] sm:$0xff] %v1692_v58  ;;  %v2455_v58 = vperm.slane %v1574_v63, 6 }
  0xd4   : > { %2429 = vst [vmem:[#allocation47_spill] sm:$0xff] %v1704_v13  ;;  %v441_v13 = vmul.f32 %v2450_v48, %v1580_v24 }
  0xd5   : > { %2430 = vst [vmem:[#allocation48_spill] sm:$0xff] %v1707_v1  ;;  %v446_v48 = vmul.f32 %v2455_v58, %v1580_v24  ;;  %v459_v58 = vmul.f32 %v2460_v53, %v1580_v24  ;;  %v1814_v53 = vadd.f32 %v1590_v16, %v1456_v50  ;;  %v1835_v16 = vadd.f32 %v430_v33, %v1456_v50 }
  0xd6   : > { %2431 = vst [vmem:[#allocation49_spill] sm:$0xff] %v1710_v56 }
  0xd7   : > { %2432 = vst [vmem:[#allocation50_spill] sm:$0xff] %v1713_v25  ;;  %v1261_v25 = vld [vmem:[#allocation2 + $0xa0] ss:$0 sm:$0xff] }
  0xd8   : > { %2433 = vst [vmem:[#allocation51_spill] sm:$0xff] %v1716_v17  ;;  %v2447_v17 = vperm.slane %v1454_v49, 6  ;;  %v464_v51 = vmul.f32 %v1261_v25, %v1580_v24 }
  0xd9   : > { %2434 = vst [vmem:[#allocation52_spill] sm:$0xff] %v1719_v30  ;;  %v2446_v30 = vperm.slane %v1454_v49, 5 }
  0xda   : > { %2435 = vst [vmem:[#allocation53_spill] sm:$0xff] %v1722_v7  ;;  %v2444_v7 = vperm.slane %v1454_v49, 3  ;;  %v438_v34 = vmul.f32 %v2447_v17, %v1580_v24  ;;  %v2452_v17 = vperm.slane %v1574_v63, 3 }
  0xdb   : > { %2436 = vst [vmem:[#allocation54_spill] sm:$0xff] %v1725_v9  ;;  %v2443_v9 = vperm.slane %v1454_v49, 2  ;;  %v437_v62 = vmul.f32 %v2446_v30, %v1580_v24  ;;  %v2451_v30 = vperm.slane %v1574_v63, 2 }
  0xdc   : > { %v435_v26 = vmul.f32 %v2444_v7, %v1580_v24  ;;  %v2449_v7 = vperm.slane %v1574_v63, 0  ;;  %v443_v11 = vmul.f32 %v2452_v17, %v1580_v24  ;;  %v456_v17 = vmul.f32 %v2457_v18, %v1580_v24 }
  0xdd   : > { %v434_v60 = vmul.f32 %v2443_v9, %v1580_v24  ;;  %v2448_v9 = vperm.slane %v1454_v49, 7  ;;  %v442_v12 = vmul.f32 %v2451_v30, %v1580_v24  ;;  %v2453_v49 = vperm.slane %v1574_v63, 4 }
  0xde   : > { %v440_v1 = vmul.f32 %v2449_v7, %v1580_v24  ;;  %v445_v7 = vmul.f32 %v2454_v61, %v1580_v24  ;;  %v447_v30 = vmul.f32 %v2456_v57, %v1580_v24  ;;  %v458_v61 = vmul.f32 %v2459_v55, %v1580_v24 }
  0xdf   : > { %v439_v56 = vmul.f32 %v2448_v9, %v1580_v24  ;;  %v444_v9 = vmul.f32 %v2453_v49, %v1580_v24  ;;  %v457_v49 = vmul.f32 %v2458_v54, %v1580_v24  ;;  %v2461_v63 = vperm.slane %v1562_v29, 4 }
  0xe0   : > { %v461_v18 = vmul.f32 %v2462_v3, %v1580_v24  ;;  %v462_v54 = vmul.f32 %v2463_v52, %v1580_v24  ;;  %v463_v55 = vmul.f32 %v2464_v32, %v1580_v24  ;;  %v1822_v3 = vadd.f32 %v1596_v14, %v1456_v50 }
  0xe1   : > { %v460_v57 = vmul.f32 %v2461_v63, %v1580_v24  ;;  %v1818_v63 = vadd.f32 %v1593_v15, %v1456_v50  ;;  %v1826_v52 = vadd.f32 %v1602_v10, %v1456_v50  ;;  %v1829_v29 = vadd.f32 %v428_v27, %v1456_v50 }
  0xe2   : > { %v1832_v24 = vadd.f32 %v429_v21, %v1456_v50  ;;  %v1838_v15 = vadd.f32 %v431_v44, %v1456_v50  ;;  %v1841_v32 = vadd.f32 %v432_v0, %v1456_v50  ;;  %v1844_v14 = vadd.f32 %v433_v28, %v1456_v50 }
  0xe3   : > { %v1847_v10 = vadd.f32 %v434_v60, %v1456_v50  ;;  %v1850_v25 = vadd.f32 %v435_v26, %v1456_v50  ;;  %v1853_v21 = vadd.f32 %v436_v2, %v1456_v50  ;;  %v1856_v33 = vadd.f32 %v437_v62, %v1456_v50 }
  0xe4   : > { %v1859_v27 = vadd.f32 %v438_v34, %v1456_v50  ;;  %v1862_v0 = vadd.f32 %v439_v56, %v1456_v50  ;;  %v1865_v44 = vadd.f32 %v440_v1, %v1456_v50  ;;  %v1868_v28 = vadd.f32 %v441_v13, %v1456_v50  ;;  %v507_v56 = vld [vmem:[#allocation2 + $0x1] ss:$4 sm:$0xff] }
  0xe5   : > { %v1871_v60 = vadd.f32 %v442_v12, %v1456_v50  ;;  %v1874_v26 = vadd.f32 %v443_v11, %v1456_v50  ;;  %v1877_v2 = vadd.f32 %v444_v9, %v1456_v50  ;;  %v1880_v62 = vadd.f32 %v445_v7, %v1456_v50 }
  0xe6   : > { %v1883_v34 = vadd.f32 %v446_v48, %v1456_v50  ;;  %v1886_v1 = vadd.f32 %v447_v30, %v1456_v50  ;;  %v1889_v13 = vadd.f32 %v456_v17, %v1456_v50  ;;  %v1892_v12 = vadd.f32 %v457_v49, %v1456_v50  ;;  %v1906_v30 = vld [vmem:[#allocation2 + $0x81] ss:$4 sm:$0xff] }
  0xe7   : > { %2465 = vst [vmem:[#allocation55_spill] sm:$0xff] %v1877_v2  ;;  %v1895_v11 = vadd.f32 %v458_v61, %v1456_v50  ;;  %v1898_v9 = vadd.f32 %v459_v58, %v1456_v50  ;;  %v1901_v7 = vadd.f32 %v460_v57, %v1456_v50  ;;  %v1904_v48 = vadd.f32 %v461_v18, %v1456_v50 }
  0xe8   : > { %2466 = vst [vmem:[#allocation56_spill] sm:$0xff] %v1880_v62  ;;  %v1909_v17 = vadd.f32 %v462_v54, %v1456_v50  ;;  %v1912_v49 = vadd.f32 %v463_v55, %v1456_v50  ;;  %v1915_v61 = vadd.f32 %v464_v51, %v1456_v50  ;;  %v529_v58 = vperm.slane %v507_v56, 1 }
  0xe9   : > { %2467 = vst [vmem:[#allocation57_spill] sm:$0xff] %v1883_v34  ;;  %v532_v57 = vperm.slane %v507_v56, 4  ;;  %v534_v18 = vperm.slane %v507_v56, 6  ;;  %v560_v23 = vperm.slane %v1906_v30, 0  ;;  %v561_v54 = vperm.slane %v1906_v30, 1 }
  0xea   : > { %2468 = vst [vmem:[#allocation58_spill] sm:$0xff] %v1886_v1  ;;  %v563_v55 = vperm.slane %v1906_v30, 3  ;;  %v564_v50 = vperm.slane %v1906_v30, 4  ;;  %v565_v51 = vperm.slane %v1906_v30, 5  ;;  %v2494_v2 = vperm.slane %v1586_v19, 6 }
  0xeb   : > { %2469 = vst [vmem:[#allocation59_spill] sm:$0xff] %v1889_v13  ;;  %v533_v13 = vperm.slane %v507_v56, 5 }
  0xec   : > { %2470 = vst [vmem:[#allocation60_spill] sm:$0xff] %v1892_v12  ;;  %v531_v12 = vperm.slane %v507_v56, 3 }
  0xed   : > { %2471 = vst [vmem:[#allocation61_spill] sm:$0xff] %v1895_v11  ;;  %v528_v11 = vperm.slane %v507_v56, 0 }
  0xee   : > { %2472 = vst [vmem:[#allocation62_spill] sm:$0xff] %v1898_v9  ;;  %v530_v9 = vperm.slane %v507_v56, 2 }
  0xef   : > { %2473 = vst [vmem:[#allocation63_spill] sm:$0xff] %v1901_v7  ;;  %v520_v7 = vpop.permute.xlu0 %519 }
  0xf0   : > { %2474 = vst [vmem:[#allocation64_spill] sm:$0xff] %v1904_v48  ;;  %v535_v48 = vperm.slane %v507_v56, 7  ;;  %v610_v47 = vmul.f32 %v528_v11, %v520_v7  ;;  %v611_v4 = vmul.f32 %v529_v58, %v520_v7  ;;  %v612_v46 = vmul.f32 %v530_v9, %v520_v7 }
  0xf1   : > { %2475 = vst [vmem:[#allocation65_spill] sm:$0xff] %v1909_v17  ;;  %v562_v17 = vperm.slane %v1906_v30, 2  ;;  %v613_v56 = vmul.f32 %v531_v12, %v520_v7  ;;  %v614_v22 = vmul.f32 %v532_v57, %v520_v7  ;;  %v615_v45 = vmul.f32 %v533_v13, %v520_v7 }
  0xf2   : > { %2476 = vst [vmem:[#allocation66_spill] sm:$0xff] %v1912_v49  ;;  %v567_v49 = vperm.slane %v1906_v30, 7  ;;  %v616_v5 = vmul.f32 %v534_v18, %v520_v7  ;;  %v617_v43 = vmul.f32 %v535_v48, %v520_v7  ;;  %v618_v6 = vmul.f32 %v2478_v20, %v520_v7 }
  0xf3   : > { %2477 = vst [vmem:[#allocation67_spill] sm:$0xff] %v1915_v61  ;;  %v566_v61 = vperm.slane %v1906_v30, 6  ;;  %v619_v1 = vmul.f32 %v2479_v42, %v520_v7  ;;  %v620_v34 = vmul.f32 %v2480_v41, %v520_v7  ;;  %v621_v30 = vmul.f32 %v2481_v40, %v520_v7 }
  0xf4   : > { %v2482_v11 = vperm.slane %v1466_v59, 4  ;;  %v2483_v12 = vperm.slane %v1466_v59, 5  ;;  %v2484_v48 = vperm.slane %v1466_v59, 6  ;;  %v2485_v20 = vperm.slane %v1466_v59, 7 }
  0xf5   : > { %v2486_v42 = vperm.slane %v1586_v19, 0  ;;  %v2487_v41 = vperm.slane %v1586_v19, 1  ;;  %v2488_v40 = vperm.slane %v1586_v19, 2  ;;  %v2005_v35 = vmul.f32 %v560_v23, %v520_v7 }
  0xf6   : > { %v622_v9 = vmul.f32 %v2482_v11, %v520_v7  ;;  %v623_v13 = vmul.f32 %v2483_v12, %v520_v7  ;;  %v624_v58 = vmul.f32 %v2484_v48, %v520_v7  ;;  %v625_v57 = vmul.f32 %v2485_v20, %v520_v7 }
  0xf7   : > { %v1943_v18 = vmul.f32 %v2486_v42, %v520_v7  ;;  %v1947_v62 = vmul.f32 %v2487_v41, %v520_v7  ;;  %v1951_v11 = vmul.f32 %v2488_v40, %v520_v7  ;;  %v2489_v12 = vperm.slane %v1586_v19, 3 }
  0xf8   : > { %v2490_v48 = vperm.slane %v1586_v19, 4  ;;  %v2492_v20 = vperm.slane %v1586_v19, 5  ;;  %v1967_v41 = vmul.f32 %v2494_v2, %v520_v7  ;;  %v1971_v40 = vmul.f32 %v2496_v38, %v520_v7 }
  0xf9   : > { %v1955_v39 = vmul.f32 %v2489_v12, %v520_v7  ;;  %v1975_v12 = vmul.f32 %v2498_v37, %v520_v7  ;;  %v2504_v2 = vperm.slane %v1656_v31, 3  ;;  %v2506_v19 = vperm.slane %v1656_v31, 4 }
  0xfa   : > { %v1959_v59 = vmul.f32 %v2490_v48, %v520_v7  ;;  %v1963_v42 = vmul.f32 %v2492_v20, %v520_v7  ;;  %2495 = vst [vmem:[#allocation70_spill] sm:$0xff] %v1967_v41  ;;  %v2500_v48 = vperm.slane %v1656_v31, 1  ;;  %v2502_v20 = vperm.slane %v1656_v31, 2 }
  0xfb   : > { %2497 = vst [vmem:[#allocation71_spill] sm:$0xff] %v1971_v40  ;;  %v1987_v41 = vmul.f32 %v2504_v2, %v520_v7  ;;  %v1991_v38 = vmul.f32 %v2506_v19, %v520_v7  ;;  %v693_v40 = vld [vmem:[#allocation2 + $0x2] ss:$4 sm:$0xff]  ;;  %v2508_v37 = vperm.slane %v1656_v31, 5  ;;  %v2007_v2 = vmul.f32 %v561_v54, %v520_v7 }
  0xfc   : > { %2491 = vst [vmem:[#allocation68_spill] sm:$0xff] %v1959_v59  ;;  %v1979_v59 = vmul.f32 %v2500_v48, %v520_v7  ;;  %v2510_v48 = vperm.slane %v1656_v31, 6  ;;  %v2011_v19 = vmul.f32 %v563_v55, %v520_v7  ;;  %v715_v23 = vperm.slane %v693_v40, 1 }
  0xfd   : > { %2493 = vst [vmem:[#allocation69_spill] sm:$0xff] %v1963_v42  ;;  %v1983_v42 = vmul.f32 %v2502_v20, %v520_v7  ;;  %v2512_v20 = vperm.slane %v1656_v31, 7  ;;  %v2021_v31 = vmul.f32 %v1262_v36, %v520_v7  ;;  %v717_v54 = vperm.slane %v693_v40, 3 }
  0xfe   : > { %2499 = vst [vmem:[#allocation72_spill] sm:$0xff] %v1975_v12  ;;  %v1995_v12 = vmul.f32 %v2508_v37, %v520_v7  ;;  %v2015_v37 = vmul.f32 %v565_v51, %v520_v7  ;;  %v652_v55 = vadd.f32 %v611_v4, %v1818_v63  ;;  %v718_v51 = vperm.slane %v693_v40, 4 }
  0xff   : > { %2501 = vst [vmem:[#allocation73_spill] sm:$0xff] %v1979_v59  ;;  %v1999_v59 = vmul.f32 %v2510_v48, %v520_v7  ;;  %v2019_v48 = vmul.f32 %v567_v49, %v520_v7  ;;  %v655_v49 = vadd.f32 %v614_v22, %v1829_v29  ;;  %v656_v36 = vadd.f32 %v615_v45, %v1832_v24 }
 0x100   : > { %2503 = vst [vmem:[#allocation74_spill] sm:$0xff] %v1983_v42  ;;  %v2003_v42 = vmul.f32 %v2512_v20, %v520_v7  ;;  %v716_v20 = vperm.slane %v693_v40, 2  ;;  %v721_v4 = vperm.slane %v693_v40, 7  ;;  %v659_v22 = vadd.f32 %v618_v6, %v1841_v32 }
 0x101   : > { %2505 = vst [vmem:[#allocation75_spill] sm:$0xff] %v1987_v41  ;;  %v2009_v41 = vmul.f32 %v562_v17, %v520_v7  ;;  %v651_v17 = vadd.f32 %v610_v47, %v1814_v53  ;;  %v660_v45 = vadd.f32 %v619_v1, %v1844_v14  ;;  %v664_v29 = vadd.f32 %v623_v13, %v1856_v33 }
 0x102   : > { %2507 = vst [vmem:[#allocation76_spill] sm:$0xff] %v1991_v38  ;;  %v2013_v38 = vmul.f32 %v564_v50, %v520_v7  ;;  %v653_v50 = vadd.f32 %v612_v46, %v1822_v3  ;;  %v666_v6 = vadd.f32 %v625_v57, %v1862_v0  ;;  %v2056_v33 = vadd.f32 %v1947_v62, %v1868_v28 }
 0x103   : > { %2509 = vst [vmem:[#allocation77_spill] sm:$0xff] %v1995_v12  ;;  %v2017_v12 = vmul.f32 %v566_v61, %v520_v7  ;;  %v654_v61 = vadd.f32 %v613_v56, %v1826_v52  ;;  %v719_v7 = vperm.slane %v693_v40, 5  ;;  %v663_v52 = vadd.f32 %v622_v9, %v1853_v21 }
 0x104   : > { %2511 = vst [vmem:[#allocation78_spill] sm:$0xff] %v1999_v59  ;;  %v714_v59 = vperm.slane %v693_v40, 0  ;;  %v667_v21 = vadd.f32 %v1943_v18, %v1865_v44  ;;  %v2063_v56 = vadd.f32 %v1951_v11, %v1871_v60  ;;  %v2518_v44 = vperm.slane %v1480_v8, 1  ;;  %v2521_v60 = vld [vmem:[#allocation8_spill] sm:$0xff] }
 0x105   : > { %2513 = vst [vmem:[#allocation79_spill] sm:$0xff] %v2007_v2  ;;  %v2023_v2 = vpop.permute.xlu1 %705  ;;  %v2519_v28 = vperm.slane %v1480_v8, 2 }
 0x106   : > { %2514 = vst [vmem:[#allocation80_spill] sm:$0xff] %v2017_v12  ;;  %v720_v12 = vperm.slane %v693_v40, 6  ;;  %v796_v47 = vmul.f32 %v714_v59, %v2023_v2  ;;  %v797_v46 = vmul.f32 %v715_v23, %v2023_v2  ;;  %v798_v53 = vmul.f32 %v716_v20, %v2023_v2  ;;  %v2522_v40 = vld [vmem:[#allocation9_spill] sm:$0xff]  ;;  %v2524_v23 = vld [vmem:[#allocation11_spill] sm:$0xff] }
 0x107   : > { %2515 = vst [vmem:[#allocation81_spill] sm:$0xff] %v2019_v48  ;;  %v658_v48 = vadd.f32 %v617_v43, %v1838_v15  ;;  %v799_v63 = vmul.f32 %v717_v54, %v2023_v2  ;;  %v800_v3 = vmul.f32 %v718_v51, %v2023_v2  ;;  %v662_v43 = vadd.f32 %v621_v30, %v1850_v25  ;;  %v2525_v54 = vld [vmem:[#allocation55_spill] sm:$0xff] }
 0x108   : > { %2516 = vst [vmem:[#allocation82_spill] sm:$0xff] %v2021_v31  ;;  %v657_v31 = vadd.f32 %v616_v5, %v1835_v16  ;;  %v661_v5 = vadd.f32 %v620_v34, %v1847_v10  ;;  %v801_v24 = vmul.f32 %v719_v7, %v2023_v2  ;;  %v665_v16 = vadd.f32 %v624_v58, %v1859_v27 }
 0x109   : > { %v802_v15 = vmul.f32 %v720_v12, %v2023_v2  ;;  %v837_v32 = vadd.f32 %v796_v47, %v651_v17  ;;  %v803_v14 = vmul.f32 %v721_v4, %v2023_v2  ;;  %v838_v10 = vadd.f32 %v797_v46, %v652_v55  ;;  %v2526_v17 = vld [vmem:[#allocation68_spill] sm:$0xff] }
 0x10a   : > { %v839_v34 = vadd.f32 %v798_v53, %v653_v50  ;;  %v840_v25 = vadd.f32 %v799_v63, %v654_v61  ;;  %v2517_v27 = vperm.slane %v1480_v8, 0  ;;  %v841_v0 = vadd.f32 %v800_v3, %v655_v49  ;;  %v2528_v49 = vld [vmem:[#allocation12_spill] sm:$0xff]  ;;  %v2532_v53 = vld [vmem:[#allocation13_spill] sm:$0xff]  ;;  %v2534_v3 = vld [vmem:[#allocation70_spill] sm:$0xff] }
 0x10b   : > { %v2067_v30 = vadd.f32 %v1955_v39, %v1874_v26  ;;  %v805_v9 = vmul.f32 %v2518_v44, %v2023_v2  ;;  %v842_v13 = vadd.f32 %v801_v24, %v656_v36  ;;  %v806_v62 = vmul.f32 %v2519_v28, %v2023_v2  ;;  %v2523_v26 = vld [vmem:[#allocation10_spill] sm:$0xff]  ;;  %v2530_v36 = vld [vmem:[#allocation69_spill] sm:$0xff] }
 0x10c   : > { %v804_v1 = vmul.f32 %v2517_v27, %v2023_v2  ;;  %v2520_v58 = vperm.slane %v1480_v8, 3  ;;  %v843_v18 = vadd.f32 %v802_v15, %v657_v31  ;;  %v1023_v11 = vadd.f32 %v2521_v60, %v837_v32  ;;  %v2538_v27 = vld [vmem:[#allocation71_spill] sm:$0xff]  ;;  %v2541_v28 = vld [vmem:[#allocation38_spill] sm:$0xff] }
 0x10d   : > { %v844_v59 = vadd.f32 %v803_v14, %v658_v48  ;;  %v1024_v39 = vadd.f32 %v2522_v40, %v838_v10  ;;  %v1025_v12 = vadd.f32 %v2523_v26, %v839_v34  ;;  %v1026_v20 = vadd.f32 %v2524_v23, %v840_v25  ;;  %v2529_v48 = vld [vmem:[#allocation56_spill] sm:$0xff]  ;;  %v2536_v10 = vld [vmem:[#allocation14_spill] sm:$0xff]  ;;  %v2547_v26 = vld [vmem:[#allocation73_spill] sm:$0xff] }
 0x10e   : > { %v807_v57 = vmul.f32 %v2520_v58, %v2023_v2  ;;  %v2084_v55 = vadd.f32 %v2526_v17, %v2525_v54  ;;  %v2527_v50 = vperm.slane %v1480_v8, 4  ;;  %v845_v61 = vadd.f32 %v804_v1, %v659_v22  ;;  %1064 = vst [vmem:[%s2090_s6] sm:$0xff] %v1023_v11  ;;  %v2533_v22 = vld [vmem:[#allocation57_spill] sm:$0xff]  ;;  %v2537_v25 = vld [vmem:[#allocation58_spill] sm:$0xff]  ;;  %v2542_v58 = vld [vmem:[#allocation72_spill] sm:$0xff] }
 0x10f   : > { %v1027_v31 = vadd.f32 %v2528_v49, %v841_v0  ;;  %v2095_v7 = vadd.f32 %v2530_v36, %v2529_v48  ;;  %v2531_v47 = vperm.slane %v1480_v8, 5  ;;  %v846_v46 = vadd.f32 %v805_v9, %v660_v45  ;;  %1065 = vst [vmem:[%s2090_s6 + $0x8] sm:$0xff] %v1024_v39  ;;  %v2540_v9 = vld [vmem:[#allocation15_spill] sm:$0xff]  ;;  %v2545_v40 = vld [vmem:[#allocation16_spill] sm:$0xff]  ;;  %v2549_v23 = vld [vmem:[#allocation17_spill] sm:$0xff] }
 0x110   : > { %v808_v51 = vmul.f32 %v2527_v50, %v2023_v2  ;;  %v1028_v63 = vadd.f32 %v2532_v53, %v842_v13  ;;  %v2104_v24 = vadd.f32 %v2534_v3, %v2533_v22  ;;  %v2535_v15 = vperm.slane %v1480_v8, 6  ;;  %1066 = vst [vmem:[%s2090_s6 + $0x10] sm:$0xff] %v1025_v12  ;;  %v2550_v54 = vld [vmem:[#allocation40_spill] sm:$0xff]  ;;  %v2551_v17 = vld [vmem:[#allocation74_spill] sm:$0xff]  ;;  %v2554_v48 = vld [vmem:[#allocation41_spill] sm:$0xff] }
 0x111   : > { %v809_v4 = vmul.f32 %v2531_v47, %v2023_v2  ;;  %v847_v14 = vadd.f32 %v806_v62, %v661_v5  ;;  %v1029_v34 = vadd.f32 %v2536_v10, %v843_v18  ;;  %v2113_v45 = vadd.f32 %v2538_v27, %v2537_v25  ;;  %1067 = vst [vmem:[%s2090_s6 + $0x18] sm:$0xff] %v1026_v20  ;;  %v2543_v62 = vld [vmem:[#allocation29_spill] sm:$0xff]  ;;  %v2553_v49 = vld [vmem:[#allocation18_spill] sm:$0xff]  ;;  %v2555_v36 = vld [vmem:[#allocation75_spill] sm:$0xff] }
 0x112   : > { %v810_v32 = vmul.f32 %v2535_v15, %v2023_v2  ;;  %v2539_v1 = vperm.slane %v1480_v8, 7  ;;  %v848_v44 = vadd.f32 %v807_v57, %v662_v43  ;;  %v1030_v13 = vadd.f32 %v2540_v9, %v844_v59  ;;  %1068 = vst [vmem:[%s2090_s6 + $0x20] sm:$0xff] %v1027_v31  ;;  %v2546_v8 = vld [vmem:[#allocation39_spill] sm:$0xff]  ;;  %v2558_v22 = vld [vmem:[#allocation42_spill] sm:$0xff]  ;;  %v2559_v3 = vld [vmem:[#allocation76_spill] sm:$0xff] }
 0x113   : > { %v2122_v5 = vadd.f32 %v2542_v58, %v2541_v28  ;;  %v2544_v18 = vperm.slane %v2543_v62, 0  ;;  %v849_v11 = vadd.f32 %v808_v51, %v663_v52  ;;  %v1031_v39 = vadd.f32 %v2545_v40, %v845_v61  ;;  %1069 = vst [vmem:[%s2090_s6 + $0x28] sm:$0xff] %v1028_v63  ;;  %v2557_v53 = vld [vmem:[#allocation19_spill] sm:$0xff]  ;;  %v2561_v10 = vld [vmem:[#allocation20_spill] sm:$0xff]  ;;  %v2563_v27 = vld [vmem:[#allocation77_spill] sm:$0xff] }
 0x114   : > { %v811_v0 = vmul.f32 %v2539_v1, %v2023_v2  ;;  %v2131_v43 = vadd.f32 %v2547_v26, %v2546_v8  ;;  %v2548_v57 = vperm.slane %v2543_v62, 1  ;;  %v850_v12 = vadd.f32 %v809_v4, %v664_v29  ;;  %1070 = vst [vmem:[%s2090_s6 + $0x30] sm:$0xff] %v1029_v34  ;;  %v2562_v25 = vld [vmem:[#allocation43_spill] sm:$0xff]  ;;  %v2565_v9 = vld [vmem:[#allocation21_spill] sm:$0xff]  ;;  %v2566_v28 = vld [vmem:[#allocation44_spill] sm:$0xff] }
 0x115   : > { %v812_v60 = vmul.f32 %v2544_v18, %v2023_v2  ;;  %v1032_v20 = vadd.f32 %v2549_v23, %v846_v46  ;;  %v2140_v52 = vadd.f32 %v2551_v17, %v2550_v54  ;;  %v2552_v50 = vperm.slane %v2543_v62, 2  ;;  %1071 = vst [vmem:[%s2090_s6 + $0x38] sm:$0xff] %v1030_v13  ;;  %v2567_v58 = vld [vmem:[#allocation78_spill] sm:$0xff]  ;;  %v2570_v8 = vld [vmem:[#allocation45_spill] sm:$0xff]  ;;  %v2572_v23 = vld [vmem:[#allocation23_spill] sm:$0xff] }
 0x116   : > { %v813_v59 = vmul.f32 %v2548_v57, %v2023_v2  ;;  %v851_v61 = vadd.f32 %v810_v32, %v665_v16  ;;  %v1033_v31 = vadd.f32 %v2553_v49, %v847_v14  ;;  %v2149_v29 = vadd.f32 %v2555_v36, %v2554_v48  ;;  %1072 = vst [vmem:[%s2090_s6 + $0x40] sm:$0xff] %v1031_v39  ;;  %v2569_v40 = vld [vmem:[#allocation22_spill] sm:$0xff]  ;;  %v2574_v17 = vld [vmem:[#allocation60_spill] sm:$0xff]  ;;  %v2579_v36 = vld [vmem:[#allocation31_spill] sm:$0xff] }
 0x117   : > { %v814_v51 = vmul.f32 %v2552_v50, %v2023_v2  ;;  %v2556_v47 = vperm.slane %v2543_v62, 3  ;;  %v852_v46 = vadd.f32 %v811_v0, %v666_v6  ;;  %v1034_v63 = vadd.f32 %v2557_v53, %v848_v44  ;;  %1073 = vst [vmem:[%s2090_s6 + $0x48] sm:$0xff] %v1032_v20  ;;  %v2189_v26 = vld [vmem:[#allocation2 + $0x82] ss:$4 sm:$0xff] }
 0x118   : > { %v2158_v16 = vadd.f32 %v2559_v3, %v2558_v22  ;;  %v2560_v15 = vperm.slane %v2543_v62, 4  ;;  %v853_v14 = vadd.f32 %v812_v60, %v667_v21  ;;  %v1035_v34 = vadd.f32 %v2561_v10, %v849_v11  ;;  %1074 = vst [vmem:[%s2090_s6 + $0x50] sm:$0xff] %v1033_v31  ;;  %v2575_v50 = vld [vmem:[#allocation79_spill] sm:$0xff]  ;;  %v2578_v31 = vld [vmem:[#allocation62_spill] sm:$0xff] }
 0x119   : > { %v815_v4 = vmul.f32 %v2556_v47, %v2023_v2  ;;  %v2167_v6 = vadd.f32 %v2563_v27, %v2562_v25  ;;  %v2564_v1 = vperm.slane %v2543_v62, 5  ;;  %v854_v44 = vadd.f32 %v813_v59, %v2056_v33  ;;  %1075 = vst [vmem:[%s2090_s6 + $0x58] sm:$0xff] %v1034_v63  ;;  %v2586_v27 = vld [vmem:[#allocation34_spill] sm:$0xff] }
 0x11a   : > { %v816_v32 = vmul.f32 %v2560_v15, %v2023_v2  ;;  %v1036_v13 = vadd.f32 %v2565_v9, %v850_v12  ;;  %v2177_v21 = vadd.f32 %v2567_v58, %v2566_v28  ;;  %v2568_v18 = vperm.slane %v2543_v62, 6  ;;  %1076 = vst [vmem:[%s2090_s6 + $0x60] sm:$0xff] %v1035_v34 }
 0x11b   : > { %v817_v0 = vmul.f32 %v2564_v1, %v2023_v2  ;;  %v855_v11 = vadd.f32 %v814_v51, %v2063_v56  ;;  %v1037_v39 = vadd.f32 %v2569_v40, %v851_v61  ;;  %v2187_v33 = vadd.f32 %v2003_v42, %v2570_v8  ;;  %v2573_v56 = vld [vmem:[#allocation59_spill] sm:$0xff]  ;;  %v2576_v61 = vld [vmem:[#allocation30_spill] sm:$0xff] }
 0x11c   : > { %v818_v60 = vmul.f32 %v2568_v18, %v2023_v2  ;;  %v2571_v57 = vperm.slane %v2543_v62, 7  ;;  %v856_v12 = vadd.f32 %v815_v4, %v2067_v30  ;;  %v1038_v20 = vadd.f32 %v2572_v23, %v852_v46  ;;  %v2577_v62 = vld [vmem:[#allocation61_spill] sm:$0xff]  ;;  %1077 = vst [vmem:[%s2090_s6 + $0x68] sm:$0xff] %v1036_v13  ;;  %v2580_v4 = vld [vmem:[#allocation46_spill] sm:$0xff]  ;;  %v2588_v13 = vld [vmem:[#allocation35_spill] sm:$0xff] }
 0x11d   : > { %v2199_v54 = vadd.f32 %v2005_v35, %v2573_v56  ;;  %v2203_v42 = vadd.f32 %v2575_v50, %v2574_v17  ;;  %v857_v51 = vadd.f32 %v816_v32, %v2084_v55  ;;  %v1039_v49 = vadd.f32 %v2576_v61, %v853_v14  ;;  %1078 = vst [vmem:[%s2090_s6 + $0x70] sm:$0xff] %v1037_v39  ;;  %v2584_v32 = vld [vmem:[#allocation33_spill] sm:$0xff]  ;;  %v2594_v17 = vld [vmem:[#allocation47_spill] sm:$0xff] }
 0x11e   : > { %v819_v59 = vmul.f32 %v2571_v57, %v2023_v2  ;;  %v2210_v30 = vadd.f32 %v2009_v41, %v2577_v62  ;;  %v2214_v48 = vadd.f32 %v2011_v19, %v2578_v31  ;;  %v858_v35 = vadd.f32 %v817_v0, %v2095_v7  ;;  %v2582_v41 = vld [vmem:[#allocation32_spill] sm:$0xff]  ;;  %1079 = vst [vmem:[%s2090_s6 + $0x78] sm:$0xff] %v1038_v20 }
 0x11f   : > { %v1040_v47 = vadd.f32 %v2579_v36, %v854_v44  ;;  %v746_v55 = vperm.slane %v2189_v26, 0  ;;  %v2581_v46 = vperm.slane %v2580_v4, 0  ;;  %v859_v63 = vadd.f32 %v818_v60, %v2104_v24  ;;  %1080 = vst [vmem:[%s2090_s6 + $0x80] sm:$0xff] %v1039_v49  ;;  %v2596_v62 = vld [vmem:[#allocation48_spill] sm:$0xff] }
 0x120   : > { %v1041_v22 = vadd.f32 %v2582_v41, %v855_v11  ;;  %v747_v19 = vperm.slane %v2189_v26, 1  ;;  %v2583_v7 = vperm.slane %v2580_v4, 1  ;;  %v860_v15 = vadd.f32 %v819_v59, %v2113_v45  ;;  %v2590_v11 = vld [vmem:[#allocation36_spill] sm:$0xff]  ;;  %v2592_v59 = vld [vmem:[#allocation37_spill] sm:$0xff]  ;;  %v2599_v41 = vld [vmem:[#allocation63_spill] sm:$0xff] }
 0x121   : > { %v820_v53 = vmul.f32 %v2581_v46, %v2023_v2  ;;  %v1042_v14 = vadd.f32 %v2584_v32, %v856_v12  ;;  %v748_v10 = vperm.slane %v2189_v26, 2  ;;  %v2585_v24 = vperm.slane %v2580_v4, 2  ;;  %1081 = vst [vmem:[%s2090_s6 + $0x88] sm:$0xff] %v1040_v47  ;;  %v2597_v47 = vld [vmem:[#allocation49_spill] sm:$0xff] }
 0x122   : > { %v821_v3 = vmul.f32 %v2583_v7, %v2023_v2  ;;  %v1043_v1 = vadd.f32 %v2586_v27, %v857_v51  ;;  %v749_v0 = vperm.slane %v2189_v26, 3  ;;  %v2587_v45 = vperm.slane %v2580_v4, 3  ;;  %1082 = vst [vmem:[%s2090_s6 + $0x90] sm:$0xff] %v1041_v22 }
 0x123   : > { %v822_v34 = vmul.f32 %v2585_v24, %v2023_v2  ;;  %v861_v25 = vadd.f32 %v820_v53, %v2122_v5  ;;  %v1044_v28 = vadd.f32 %v2588_v13, %v858_v35  ;;  %v750_v58 = vperm.slane %v2189_v26, 4  ;;  %1083 = vst [vmem:[%s2090_s6 + $0x98] sm:$0xff] %v1042_v14  ;;  %v2598_v53 = vld [vmem:[#allocation50_spill] sm:$0xff] }
 0x124   : > { %v823_v44 = vmul.f32 %v2587_v45, %v2023_v2  ;;  %v862_v9 = vadd.f32 %v821_v3, %v2131_v43  ;;  %v2589_v5 = vperm.slane %v2580_v4, 4  ;;  %v1045_v40 = vadd.f32 %v2590_v11, %v859_v63  ;;  %1084 = vst [vmem:[%s2090_s6 + $0xa0] sm:$0xff] %v1043_v1  ;;  %v2600_v3 = vld [vmem:[#allocation51_spill] sm:$0xff]  ;;  %v2605_v1 = vld [vmem:[#allocation53_spill] sm:$0xff]  ;;  %v2608_v13 = vld [vmem:[#allocation54_spill] sm:$0xff] }
 0x125   : > { %v863_v60 = vadd.f32 %v822_v34, %v2140_v52  ;;  %v751_v39 = vperm.slane %v2189_v26, 5  ;;  %v2591_v43 = vperm.slane %v2580_v4, 5  ;;  %v1046_v12 = vadd.f32 %v2592_v59, %v860_v15  ;;  %1085 = vst [vmem:[%s2090_s6 + $0xa8] sm:$0xff] %v1044_v28  ;;  %v2604_v34 = vld [vmem:[#allocation80_spill] sm:$0xff]  ;;  %v2607_v45 = vld [vmem:[#allocation81_spill] sm:$0xff] }
 0x126   : > { %v824_v18 = vmul.f32 %v2589_v5, %v2023_v2  ;;  %v864_v57 = vadd.f32 %v823_v44, %v2149_v29  ;;  %v2593_v23 = vperm.slane %v2580_v4, 6  ;;  %v828_v20 = vmul.f32 %v746_v55, %v2023_v2  ;;  %1086 = vst [vmem:[%s2090_s6 + $0xb0] sm:$0xff] %v1045_v40  ;;  %v2609_v5 = vld [vmem:[#allocation67_spill] sm:$0xff]  ;;  %v2611_v40 = vld [vmem:[#allocation24_spill] sm:$0xff] }
 0x127   : > { %v825_v8 = vmul.f32 %v2591_v43, %v2023_v2  ;;  %v1047_v50 = vadd.f32 %v2594_v17, %v861_v25  ;;  %v2595_v51 = vperm.slane %v2580_v4, 7  ;;  %v829_v61 = vmul.f32 %v747_v19, %v2023_v2  ;;  %1087 = vst [vmem:[%s2090_s6 + $0xb8] sm:$0xff] %v1046_v12  ;;  %v1263_v19 = vld [vmem:[#allocation2 + $0xa2] ss:$0 sm:$0xff]  ;;  %v2615_v12 = vld [vmem:[#allocation25_spill] sm:$0xff] }
 0x128   : > { %v826_v52 = vmul.f32 %v2593_v23, %v2023_v2  ;;  %v865_v56 = vadd.f32 %v824_v18, %v2158_v16  ;;  %v1048_v31 = vadd.f32 %v2596_v62, %v862_v9  ;;  %v752_v35 = vperm.slane %v2189_v26, 6  ;;  %v2610_v18 = vld [vmem:[#allocation82_spill] sm:$0xff]  ;;  %v2612_v43 = vld [vmem:[#allocation7_spill] sm:$0xff] }
 0x129   : > { %v827_v29 = vmul.f32 %v2595_v51, %v2023_v2  ;;  %v866_v49 = vadd.f32 %v825_v8, %v2167_v6  ;;  %v830_v16 = vmul.f32 %v748_v10, %v2023_v2  ;;  %v1049_v55 = vadd.f32 %v2597_v47, %v863_v60  ;;  %1088 = vst [vmem:[%s2090_s6 + $0xc0] sm:$0xff] %v1047_v50  ;;  %v2602_v10 = vld [vmem:[#allocation52_spill] sm:$0xff]  ;;  %v2613_v8 = vld [vmem:[#allocation6_spill] sm:$0xff] }
 0x12a   : > { %v867_v36 = vadd.f32 %v826_v52, %v2177_v21  ;;  %v753_v4 = vperm.slane %v2189_v26, 7  ;;  %v831_v46 = vmul.f32 %v749_v0, %v2023_v2  ;;  %v1050_v63 = vadd.f32 %v2598_v53, %v864_v57  ;;  %v2601_v26 = vld [vmem:[#allocation64_spill] sm:$0xff]  ;;  %1089 = vst [vmem:[%s2090_s6 + $0xc8] sm:$0xff] %v1048_v31 }
 0x12b   : > { %v868_v6 = vadd.f32 %v827_v29, %v2187_v33  ;;  %v687_v22 = vadd.f32 %v2013_v38, %v2599_v41  ;;  %v832_v21 = vmul.f32 %v750_v58, %v2023_v2  ;;  %v869_v7 = vadd.f32 %v828_v20, %v2199_v54  ;;  %v2603_v38 = vld [vmem:[#allocation65_spill] sm:$0xff]  ;;  %1090 = vst [vmem:[%s2090_s6 + $0xd0] sm:$0xff] %v1049_v55  ;;  %v1260_v58 = vld [vmem:[#allocation2 + $0xa3] ss:$0 sm:$0xff] }
 0x12c   : > { %v1051_v15 = vadd.f32 %v2600_v3, %v865_v56  ;;  %v688_v32 = vadd.f32 %v2015_v37, %v2601_v26  ;;  %v833_v33 = vmul.f32 %v751_v39, %v2023_v2  ;;  %v870_v14 = vadd.f32 %v829_v61, %v2203_v42  ;;  %v2606_v37 = vld [vmem:[#allocation66_spill] sm:$0xff]  ;;  %1091 = vst [vmem:[%s2090_s6 + $0xd8] sm:$0xff] %v1050_v63  ;;  %v2619_v61 = vld [vmem:[#allocation27_spill] sm:$0xff] }
 0x12d   : > { %v1052_v24 = vadd.f32 %v2602_v10, %v866_v49  ;;  %v689_v25 = vadd.f32 %v2604_v34, %v2603_v38  ;;  %v834_v54 = vmul.f32 %v752_v35, %v2023_v2  ;;  %v871_v27 = vadd.f32 %v830_v16, %v2210_v30  ;;  %v2617_v56 = vld [vmem:[#allocation26_spill] sm:$0xff]  ;;  %v2620_v35 = vld [vmem:[#allocation28_spill] sm:$0xff] }
 0x12e   : > { %v1053_v0 = vadd.f32 %v2605_v1, %v867_v36  ;;  %v690_v44 = vadd.f32 %v2607_v45, %v2606_v37  ;;  %v835_v42 = vmul.f32 %v753_v4, %v2023_v2  ;;  %v872_v9 = vadd.f32 %v831_v46, %v2214_v48  ;;  %1092 = vst [vmem:[%s2090_s6 + $0xe0] sm:$0xff] %v1051_v15 }
 0x12f   : > { %v1054_v28 = vadd.f32 %v2608_v13, %v868_v6  ;;  %v691_v60 = vadd.f32 %v2610_v18, %v2609_v5  ;;  %v836_v30 = vmul.f32 %v1263_v19, %v2023_v2  ;;  %v873_v11 = vadd.f32 %v832_v21, %v687_v22  ;;  %1093 = vst [vmem:[%s2090_s6 + $0xe8] sm:$0xff] %v1052_v24 }
 0x130   : > { %v1055_v39 = vadd.f32 %v2611_v40, %v869_v7  ;;  %v2614_v57 = vperm.slane %v2613_v8, 5  ;;  %v874_v59 = vadd.f32 %v833_v33, %v688_v32  ;;  %v1056_v23 = vadd.f32 %v2615_v12, %v870_v14  ;;  %1094 = vst [vmem:[%s2090_s6 + $0xf0] sm:$0xff] %v1053_v0 }
 0x131   : > { %v2616_v52 = vperm.slane %v2613_v8, 6  ;;  %v875_v20 = vadd.f32 %v834_v54, %v689_v25  ;;  %v1057_v17 = vadd.f32 %v2617_v56, %v871_v27  ;;  %v2618_v50 = vperm.slane %v2613_v8, 7  ;;  %1095 = vst [vmem:[%s2090_s6 + $0xf8] sm:$0xff] %v1054_v28 }
 0x132   : > { %v1019_v48 = vmul.f32 %v2614_v57, %v2612_v43  ;;  %v876_v29 = vadd.f32 %v835_v42, %v690_v44  ;;  %v1058_v49 = vadd.f32 %v2619_v61, %v872_v9  ;;  %v1022_v62 = vmul.f32 %v1260_v58, %v2612_v43  ;;  %1096 = vst [vmem:[%s2090_s6 + $0x100] sm:$0xff] %v1055_v39 }
 0x133   : > { %v1020_v2 = vmul.f32 %v2616_v52, %v2612_v43  ;;  %v1021_v51 = vmul.f32 %v2618_v50, %v2612_v43  ;;  %v877_v31 = vadd.f32 %v836_v30, %v691_v60  ;;  %v1059_v16 = vadd.f32 %v2620_v35, %v873_v11  ;;  %1097 = vst [vmem:[%s2090_s6 + $0x108] sm:$0xff] %v1056_v23 }
 0x134   : > { %v1060_v36 = vadd.f32 %v1019_v48, %v874_v59  ;;  %1098 = vst [vmem:[%s2090_s6 + $0x110] sm:$0xff] %v1057_v17 }
 0x135   : > { %v1061_v47 = vadd.f32 %v1020_v2, %v875_v20  ;;  %v1062_v55 = vadd.f32 %v1021_v51, %v876_v29  ;;  %1099 = vst [vmem:[%s2090_s6 + $0x118] sm:$0xff] %v1058_v49  ;;  %v1063_v4 = vadd.f32 %v1022_v62, %v877_v31 }
 0x136   : > { %1100 = vst [vmem:[%s2090_s6 + $0x120] sm:$0xff] %v1059_v16 }
 0x137   : > { %1101 = vst [vmem:[%s2090_s6 + $0x128] sm:$0xff] %v1060_v36 }
 0x138   : > { %1102 = vst [vmem:[%s2090_s6 + $0x130] sm:$0xff] %v1061_v47 }
 0x139   : > { %1103 = vst [vmem:[%s2090_s6 + $0x138] sm:$0xff] %v1062_v55 }
 0x13a   : > { %1105 = vst.msk [vmem:[%s2090_s6 + $0x140] sm:$0xff] %vm1104_vm7, %v1063_v4 }
 0x13b   : > { %1291 = shalt.err (!%p1288_p3)
}
 0x13c   : > { %1194 = dma.vmem_to_hbm [thread:$0]  (%p1407_p5), %s1121_s10, 5248, %s1123_s11, %s1107_s17  }
 0x13d PF: > { %p1200_p4 = scmp.ge.s32.totalorder %s1326_s15, 2  ;;  %s1134_s30 = sand.u32 1, %s1314_s12  }
 0x13e   : > { %s1135_s4 = scalar_lea.sflag [#allocation4], %s1134_s30 }
 0x13f   : > { %p1197_p7 = pnand %p1200_p4, %p1411_p6 }
 0x141   : > { %p1198_p8 = pneg %p1197_p7 }
 0x143   : > { %1309 = dma.done.wait (%p1198_p8), %s1135_s4, 5248  }
 0x144   : > { %1311 = vsyncadd (%p1198_p8), %s1135_s4, 4294962048  ;;  %p13_p9 = scmp.ge.s32.totalorder %s1394_s18, 4   ;;  %s2621_s12 = smov %s1318_s13 }
 0x145   : > { %s2622_s13 = smov %s1322_s14  ;;  %s2623_s14 = smov %s1405_s21 }
 0x146   : > { %s2624_s15 = smov %s1394_s18  ;;  %15 = sbr.rel (!%p13_p9) target bundleno = 3 (0x3), region = 90 }
 0x14b   :  { %1141 = vsyncpa [#allocation4], 1 }
 0x14c   :  { %1143 = vsyncpa [#allocation4 + $0x1], 1 }

</bundles_post_ra>
